<compile_context>
chip_gen: v6e
topology: v6e:2x2x1
jax: 0.10.0
libtpu: 0.0.40
codegen_flags: <defaults>
</compile_context>

<pallas_src>
import jax
import jax.numpy as jnp
from jax.experimental import pallas as pl
from jax.experimental.pallas import tpu as pltpu


def _conv3x3_kernel(xa_ref, xb_ref, w_ref, b_ref, o_ref, patch_ref):
    # xa_ref: (1, TH, W+2, Cin)   main rows of the zero-padded input tile
    # xb_ref: (1, 8,  W+2, Cin)   next row-block; its first 2 rows are the bottom halo
    # w_ref:  (Cout, 9*Cin)       conv weights, K ordered (kh, kw, ci); VMEM-resident
    # b_ref:  (Cout, 1)           bias
    # o_ref:  (1, Cout, TH*W)     lane-dense NCHW-flattened output tile
    # patch_ref: VMEM scratch (TH, W, 9*Cin) holding the fused im2col patch
    _, TH, Wp2, Cin = xa_ref.shape
    W = Wp2 - 2

    # (TH+2, W+2, Cin) window = main rows + 2-row bottom halo (concat on outer axis).
    xw = jnp.concatenate([xa_ref[0], xb_ref[0, :2]], axis=0)

    # im2col: write the 9 shifted (TH, W, Cin) taps side by side along K.
    for kh in range(3):
        for kw in range(3):
            tap = kh * 3 + kw
            patch_ref[:, :, tap * Cin:(tap + 1) * Cin] = xw[kh:kh + TH, kw:kw + W, :]

    # Collapse leading (spatial) dims only — lane dim (9*Cin) unchanged.
    patch = patch_ref[...].reshape(TH * W, 9 * Cin)

    # Single fused MXU matmul, K = 9*Cin, result already (Cout, TH*W) lane-dense.
    out = jax.lax.dot_general(
        w_ref[...], patch, (((1,), (1,)), ((), ())),
        preferred_element_type=jnp.float32)
    out = out + b_ref[...]                       # bias broadcast over the lane dim
    o_ref[...] = out[None].astype(o_ref.dtype)


def _pick_tile_h(H, W, Cin, Cout, budget_bytes=8 * 1024 * 1024):
    """Largest H-tile (multiple of 8, divides H, lane-aligned output block) whose
    double-buffered blocks fit a conservative per-step VMEM budget (sized with
    headroom for v7x's 64 MiB VMEM).  Accounts for the Cin -> 128 lane padding of
    the NHWC input block."""
    lane = 128

    def _sub(n):  # sublane round-up
        return ((n + 7) // 8) * 8

    def vmem_bytes(th):
        cin_pad = ((Cin + lane - 1) // lane) * lane       # Cin<128 pads to a full lane tile
        in_main = th * _sub(W + 2) * cin_pad * 4
        in_halo = 8 * _sub(W + 2) * cin_pad * 4
        out_blk = _sub(Cout) * max(th * W, lane) * 4
        patch = _sub(th * W) * ((9 * Cin + lane - 1) // lane) * lane * 4
        wgt = _sub(Cout) * lane * 4
        return 2 * (in_main + in_halo + out_blk) + patch + wgt   # I/O double-buffered

    cands = [th for th in range(8, H + 1, 8)
             if H % th == 0 and (th == H or (th * W) % 128 == 0)]
    if not cands:
        return H
    for th in sorted(cands, reverse=True):
        if vmem_bytes(th) <= budget_bytes:
            return th
    return cands[0]


def outconv_forward(x_nchw, weight, bias, *, tile_h=None,
                    vmem_limit_bytes=32 * 1024 * 1024):
    """Equivalent to nn.Conv2d(in_ch, out_ch, 3, padding=1)(x).

    x_nchw: (B, Cin, H, W)    float32
    weight: (Cout, Cin, 3, 3) float32 (PyTorch layout)
    bias:   (Cout,)           float32
    returns (B, Cout, H, W)   float32
    """
    B, Cin, H, W = x_nchw.shape
    Cout, Cin_w, KH, KW = weight.shape
    assert (KH, KW) == (3, 3) and Cin_w == Cin
    assert H % 8 == 0, "H must be a multiple of 8"
    # TODO(synk): handle ragged H (not a multiple of 8) by extra padding + masked stores.

    TH = tile_h if tile_h is not None else _pick_tile_h(H, W, Cin, Cout)
    assert H % TH == 0 and TH % 8 == 0, "tile_h must divide H and be a multiple of 8"
    assert TH == H or (TH * W) % 128 == 0, "spatial tile must keep the output block lane-aligned"
    nT = H // TH
    hb = TH // 8          # block-index stride of the 8-row halo blocks

    # NCHW -> NHWC; zero-pad 1 row/col for the conv plus 6 extra bottom rows so the
    # sublane-aligned 8-row halo block of the last tile stays fully in bounds.
    # NOTE: Cin in the lane position means the VMEM input block is lane-padded
    # (128/Cin factor); the tile chooser budgets for that explicitly.
    x_nhwc = jnp.transpose(x_nchw, (0, 2, 3, 1))
    x_pad = jnp.pad(x_nhwc, ((0, 0), (1, 7), (1, 1), (0, 0)))      # (B, H+8, W+2, Cin)

    # (Cout, Cin, 3, 3) -> (Cout, kh, kw, ci) -> one contiguous (Cout, 9*Cin) MXU operand.
    w2d = jnp.transpose(weight, (0, 2, 3, 1)).reshape(Cout, 9 * Cin)
    b2d = bias.reshape(Cout, 1)

    out_flat = pl.pallas_call(
        _conv3x3_kernel,
        out_shape=jax.ShapeDtypeStruct((B, Cout, H * W), x_nchw.dtype),
        grid_spec=pltpu.PrefetchScalarGridSpec(
            num_scalar_prefetch=0,
            grid=(B, nT),
            in_specs=[
                # main TH rows of the padded input for this tile
                pl.BlockSpec((1, TH, W + 2, Cin), lambda b, t: (b, t, 0, 0)),
                # next 8-row block; first 2 rows are the bottom halo
                pl.BlockSpec((1, 8, W + 2, Cin), lambda b, t: (b, (t + 1) * hb, 0, 0)),
                # weights / bias: constant index map -> stay VMEM-resident across steps
                pl.BlockSpec((Cout, 9 * Cin), lambda b, t: (0, 0)),
                pl.BlockSpec((Cout, 1), lambda b, t: (0, 0)),
            ],
            # lane-dense output: minor dim TH*W (>=128), NCHW-flattened -> no transpose.
            out_specs=pl.BlockSpec((1, Cout, TH * W), lambda b, t: (b, 0, t)),
            scratch_shapes=[pltpu.VMEM((TH, W, 9 * Cin), jnp.float32)],
        ),
        compiler_params=pltpu.CompilerParams(
            dimension_semantics=("parallel", "parallel"),   # batch x H-tiles shard over TCs
            vmem_limit_bytes=vmem_limit_bytes),
    )(x_pad, x_pad, w2d, b2d)

    # Free reshape (no data movement): output is already NCHW-ordered.
    return out_flat.reshape(B, Cout, H, W)


if __name__ == "__main__":
    key = jax.random.PRNGKey(0)
    B, Cin, Cout, H, W = 2, 4, 8, 16, 16

    kx, kw, kb = jax.random.split(key, 3)
    x = jax.random.normal(kx, (B, Cin, H, W), dtype=jnp.float32)

    # Deterministic init mimicking PyTorch Conv2d default (uniform +/- 1/sqrt(fan_in)).
    fan_in = Cin * 3 * 3
    bound = 1.0 / (fan_in ** 0.5)
    weight = jax.random.uniform(kw, (Cout, Cin, 3, 3), jnp.float32,
                                minval=-bound, maxval=bound)
    bias = jax.random.uniform(kb, (Cout,), jnp.float32,
                              minval=-bound, maxval=bound)

    # tile_h=8 exercises the multi-tile halo path (grid = (B, 2)).
    out = outconv_forward(x, weight, bias, tile_h=8)
    out = jax.block_until_ready(out)

    # Sanity-check against XLA's native convolution.
    ref = jax.lax.conv_general_dilated(
        x, weight, window_strides=(1, 1), padding="SAME",
        dimension_numbers=("NCHW", "OIHW", "NCHW")) + bias[None, :, None, None]
    assert out.shape == (B, Cout, H, W)
    assert jnp.allclose(out, ref, atol=1e-4, rtol=1e-4)

    print("KERNEL_OK")
</pallas_src>

<mosaic_0001>
module attributes {stable_mosaic.version = 11 : i64} {
  func.func @_conv3x3_kernel(%arg0: i32, %arg1: i32, %arg2: memref<1x8x18x4xf32, #tpu.memory_space<vmem>>, %arg3: memref<1x8x18x4xf32, #tpu.memory_space<vmem>>, %arg4: memref<8x36xf32, #tpu.memory_space<vmem>>, %arg5: memref<8x1xf32, #tpu.memory_space<vmem>>, %arg6: memref<1x8x128xf32, #tpu.memory_space<vmem>>, %arg7: memref<8x16x36xf32, #tpu.memory_space<vmem>>) attributes {dimension_semantics = [#tpu.dimension_semantics<parallel>, #tpu.dimension_semantics<parallel>], iteration_bounds = array<i64: 2, 2>, scalar_prefetch = 0 : i64, scratch_operands = 1 : i64, tpu.core_type = #tpu.core_type<tc>, window_params = [{transform_indices = @transform_0, window_bounds = array<i64: 1, 8, 18, 4>}, {transform_indices = @transform_1, window_bounds = array<i64: 1, 8, 18, 4>}, {pipeline_mode = #tpu.pipeline_mode<synchronous>, transform_indices = @transform_2, window_bounds = array<i64: 8, 36>}, {pipeline_mode = #tpu.pipeline_mode<synchronous>, transform_indices = @transform_3, window_bounds = array<i64: 8, 1>}, {transform_indices = @transform_4, window_bounds = array<i64: 1, 8, 128>}]} {
    %c0 = arith.constant 0 : index
    %c0_0 = arith.constant 0 : index
    %c0_1 = arith.constant 0 : index
    %c0_2 = arith.constant 0 : index
    %0 = vector.load %arg2[%c0, %c0_0, %c0_1, %c0_2] : memref<1x8x18x4xf32, #tpu.memory_space<vmem>>, vector<1x8x18x4xf32>
    %1 = vector.shape_cast %0 : vector<1x8x18x4xf32> to vector<8x18x4xf32>
    %c0_3 = arith.constant 0 : index
    %c0_4 = arith.constant 0 : index
    %c0_5 = arith.constant 0 : index
    %c0_6 = arith.constant 0 : index
    %2 = vector.load %arg3[%c0_3, %c0_4, %c0_5, %c0_6] : memref<1x8x18x4xf32, #tpu.memory_space<vmem>>, vector<1x2x18x4xf32>
    %3 = vector.shape_cast %2 : vector<1x2x18x4xf32> to vector<2x18x4xf32>
    %4 = tpu.concatenate %1, %3 in 0 : vector<8x18x4xf32>, vector<2x18x4xf32> -> vector<10x18x4xf32>
    %5 = vector.extract_strided_slice %4 {offsets = [0, 0, 0], sizes = [8, 16, 4], strides = [1, 1, 1]} : vector<10x18x4xf32> to vector<8x16x4xf32>
    %c0_7 = arith.constant 0 : index
    %c0_8 = arith.constant 0 : index
    %c0_9 = arith.constant 0 : index
    %6 = vector.load %arg7[%c0_7, %c0_8, %c0_9] : memref<8x16x36xf32, #tpu.memory_space<vmem>>, vector<8x16x4xf32>
    tpu.vector_store %arg7[%c0_7, %c0_8, %c0_9], %5 {strides = array<i32>} : memref<8x16x36xf32, #tpu.memory_space<vmem>>, vector<8x16x4xf32>,
    %7 = vector.extract_strided_slice %4 {offsets = [0, 1, 0], sizes = [8, 16, 4], strides = [1, 1, 1]} : vector<10x18x4xf32> to vector<8x16x4xf32>
    %c0_10 = arith.constant 0 : index
    %c0_11 = arith.constant 0 : index
    %c4 = arith.constant 4 : index
    %8 = vector.load %arg7[%c0_10, %c0_11, %c4] : memref<8x16x36xf32, #tpu.memory_space<vmem>>, vector<8x16x4xf32>
    tpu.vector_store %arg7[%c0_10, %c0_11, %c4], %7 {strides = array<i32>} : memref<8x16x36xf32, #tpu.memory_space<vmem>>, vector<8x16x4xf32>,
    %9 = vector.extract_strided_slice %4 {offsets = [0, 2, 0], sizes = [8, 16, 4], strides = [1, 1, 1]} : vector<10x18x4xf32> to vector<8x16x4xf32>
    %c0_12 = arith.constant 0 : index
    %c0_13 = arith.constant 0 : index
    %c8 = arith.constant 8 : index
    %10 = vector.load %arg7[%c0_12, %c0_13, %c8] : memref<8x16x36xf32, #tpu.memory_space<vmem>>, vector<8x16x4xf32>
    tpu.vector_store %arg7[%c0_12, %c0_13, %c8], %9 {strides = array<i32>} : memref<8x16x36xf32, #tpu.memory_space<vmem>>, vector<8x16x4xf32>,
    %11 = vector.extract_strided_slice %4 {offsets = [1, 0, 0], sizes = [8, 16, 4], strides = [1, 1, 1]} : vector<10x18x4xf32> to vector<8x16x4xf32>
    %c0_14 = arith.constant 0 : index
    %c0_15 = arith.constant 0 : index
    %c12 = arith.constant 12 : index
    %12 = vector.load %arg7[%c0_14, %c0_15, %c12] : memref<8x16x36xf32, #tpu.memory_space<vmem>>, vector<8x16x4xf32>
    tpu.vector_store %arg7[%c0_14, %c0_15, %c12], %11 {strides = array<i32>} : memref<8x16x36xf32, #tpu.memory_space<vmem>>, vector<8x16x4xf32>,
    %13 = vector.extract_strided_slice %4 {offsets = [1, 1, 0], sizes = [8, 16, 4], strides = [1, 1, 1]} : vector<10x18x4xf32> to vector<8x16x4xf32>
    %c0_16 = arith.constant 0 : index
    %c0_17 = arith.constant 0 : index
    %c16 = arith.constant 16 : index
    %14 = vector.load %arg7[%c0_16, %c0_17, %c16] : memref<8x16x36xf32, #tpu.memory_space<vmem>>, vector<8x16x4xf32>
    tpu.vector_store %arg7[%c0_16, %c0_17, %c16], %13 {strides = array<i32>} : memref<8x16x36xf32, #tpu.memory_space<vmem>>, vector<8x16x4xf32>,
    %15 = vector.extract_strided_slice %4 {offsets = [1, 2, 0], sizes = [8, 16, 4], strides = [1, 1, 1]} : vector<10x18x4xf32> to vector<8x16x4xf32>
    %c0_18 = arith.constant 0 : index
    %c0_19 = arith.constant 0 : index
    %c20 = arith.constant 20 : index
    %16 = vector.load %arg7[%c0_18, %c0_19, %c20] : memref<8x16x36xf32, #tpu.memory_space<vmem>>, vector<8x16x4xf32>
    tpu.vector_store %arg7[%c0_18, %c0_19, %c20], %15 {strides = array<i32>} : memref<8x16x36xf32, #tpu.memory_space<vmem>>, vector<8x16x4xf32>,
    %17 = vector.extract_strided_slice %4 {offsets = [2, 0, 0], sizes = [8, 16, 4], strides = [1, 1, 1]} : vector<10x18x4xf32> to vector<8x16x4xf32>
    %c0_20 = arith.constant 0 : index
    %c0_21 = arith.constant 0 : index
    %c24 = arith.constant 24 : index
    %18 = vector.load %arg7[%c0_20, %c0_21, %c24] : memref<8x16x36xf32, #tpu.memory_space<vmem>>, vector<8x16x4xf32>
    tpu.vector_store %arg7[%c0_20, %c0_21, %c24], %17 {strides = array<i32>} : memref<8x16x36xf32, #tpu.memory_space<vmem>>, vector<8x16x4xf32>,
    %19 = vector.extract_strided_slice %4 {offsets = [2, 1, 0], sizes = [8, 16, 4], strides = [1, 1, 1]} : vector<10x18x4xf32> to vector<8x16x4xf32>
    %c0_22 = arith.constant 0 : index
    %c0_23 = arith.constant 0 : index
    %c28 = arith.constant 28 : index
    %20 = vector.load %arg7[%c0_22, %c0_23, %c28] : memref<8x16x36xf32, #tpu.memory_space<vmem>>, vector<8x16x4xf32>
    tpu.vector_store %arg7[%c0_22, %c0_23, %c28], %19 {strides = array<i32>} : memref<8x16x36xf32, #tpu.memory_space<vmem>>, vector<8x16x4xf32>,
    %21 = vector.extract_strided_slice %4 {offsets = [2, 2, 0], sizes = [8, 16, 4], strides = [1, 1, 1]} : vector<10x18x4xf32> to vector<8x16x4xf32>
    %c0_24 = arith.constant 0 : index
    %c0_25 = arith.constant 0 : index
    %c32 = arith.constant 32 : index
    %22 = vector.load %arg7[%c0_24, %c0_25, %c32] : memref<8x16x36xf32, #tpu.memory_space<vmem>>, vector<8x16x4xf32>
    tpu.vector_store %arg7[%c0_24, %c0_25, %c32], %21 {strides = array<i32>} : memref<8x16x36xf32, #tpu.memory_space<vmem>>, vector<8x16x4xf32>,
    %c0_26 = arith.constant 0 : index
    %c0_27 = arith.constant 0 : index
    %c0_28 = arith.constant 0 : index
    %23 = vector.load %arg7[%c0_26, %c0_27, %c0_28] : memref<8x16x36xf32, #tpu.memory_space<vmem>>, vector<8x16x36xf32>
    %24 = vector.shape_cast %23 : vector<8x16x36xf32> to vector<128x36xf32>
    %c0_29 = arith.constant 0 : index
    %c0_30 = arith.constant 0 : index
    %25 = vector.load %arg4[%c0_29, %c0_30] : memref<8x36xf32, #tpu.memory_space<vmem>>, vector<8x36xf32>
    %cst = arith.constant dense<0.000000e+00> : vector<8x128xf32>
    %26 = tpu.matmul %25, %24, %cst {dimension_numbers = #tpu.dot_dimension_numbers<[1], [1], [0], [0], [0, 0, 1, 0], [], []>} : vector<8x36xf32>, vector<128x36xf32>, vector<8x128xf32> -> vector<8x128xf32>
    %c0_31 = arith.constant 0 : index
    %c0_32 = arith.constant 0 : index
    %27 = vector.load %arg5[%c0_31, %c0_32] : memref<8x1xf32, #tpu.memory_space<vmem>>, vector<8x1xf32>
    %28 = vector.broadcast %27 : vector<8x1xf32> to vector<8x128xf32>
    %29 = arith.addf %26, %28 : vector<8x128xf32>
    %30 = vector.shape_cast %29 : vector<8x128xf32> to vector<1x8x128xf32>
    %c0_33 = arith.constant 0 : index
    %c0_34 = arith.constant 0 : index
    %c0_35 = arith.constant 0 : index
    %31 = vector.load %arg6[%c0_33, %c0_34, %c0_35] : memref<1x8x128xf32, #tpu.memory_space<vmem>>, vector<1x8x128xf32>
    tpu.vector_store %arg6[%c0_33, %c0_34, %c0_35], %30 {strides = array<i32>} : memref<1x8x128xf32, #tpu.memory_space<vmem>>, vector<1x8x128xf32>,
    return
  }
  func.func @transform_0(%arg0: i32, %arg1: i32) -> (i32, i32, i32, i32) {
    %c0_i32 = arith.constant 0 : i32
    %c0_i32_0 = arith.constant 0 : i32
    %c0_i32_1 = arith.constant 0 : i32
    return %arg0, %arg1, %c0_i32, %c0_i32_0 : i32, i32, i32, i32
  }
  func.func @transform_1(%arg0: i32, %arg1: i32) -> (i32, i32, i32, i32) {
    %c1_i32 = arith.constant 1 : i32
    %0 = arith.addi %arg1, %c1_i32 : i32
    %c1_i32_0 = arith.constant 1 : i32
    %1 = arith.muli %0, %c1_i32_0 : i32
    %c0_i32 = arith.constant 0 : i32
    %c0_i32_1 = arith.constant 0 : i32
    %c0_i32_2 = arith.constant 0 : i32
    return %arg0, %1, %c0_i32, %c0_i32_1 : i32, i32, i32, i32
  }
  func.func @transform_2(%arg0: i32, %arg1: i32) -> (i32, i32) {
    %c0_i32 = arith.constant 0 : i32
    %c0_i32_0 = arith.constant 0 : i32
    %c0_i32_1 = arith.constant 0 : i32
    return %c0_i32, %c0_i32_0 : i32, i32
  }
  func.func @transform_3(%arg0: i32, %arg1: i32) -> (i32, i32) {
    %c0_i32 = arith.constant 0 : i32
    %c0_i32_0 = arith.constant 0 : i32
    %c0_i32_1 = arith.constant 0 : i32
    return %c0_i32, %c0_i32_0 : i32, i32
  }
  func.func @transform_4(%arg0: i32, %arg1: i32) -> (i32, i32, i32) {
    %c0_i32 = arith.constant 0 : i32
    %c0_i32_0 = arith.constant 0 : i32
    return %arg0, %c0_i32, %arg1 : i32, i32, i32
  }
}

</mosaic_0001>

<bundles_post_ra>
// kernel: tpu_custom_call.1
= control target key start
LH: loop header
LB: loop body
LE: loop exit
PB: predicated region body
PF: predicated region fallthrough
CT: control target
= control target key end

     0   :  { %9 = vsyncpa [#allocation4], 0  ;;  %s2445_s0 = inlined_call_operand.vmem [shape: f32[2,24,18,4], index: 0, kind: input, shape index: {}]   ;;  %s2446_s1 = inlined_call_operand.vmem [shape: f32[2,24,18,4], index: 1, kind: input, shape index: {}]   ;;  %s2447_s2 = inlined_call_operand.vmem [shape: f32[8,36], index: 2, kind: input, shape index: {}]   ;;  %s2448_s3 = inlined_call_operand.vmem [shape: f32[8,1], index: 3, kind: input, shape index: {}]   ;;  %s2449_s4 = inlined_call_operand.hbm [shape: f32[2,8,256], index: 4, kind: output, shape index: {}]  }
   0x1   :  { %11 = vsyncpa [#allocation4 + $0x1], 0  ;;  %s1643_s15 = smov 0   ;;  %s1645_s16 = smov 0  }
   0x2   :  { %s1647_s17 = smov 0   ;;  %s1649_s18 = smov 0  }
   0x3   :  { %s1651_s19 = smov 0   ;;  %s1653_s20 = smov 0  }
   0x4   :  { %s1655_s21 = smov 0   ;;  %s1657_s22 = smov 0  }
   0x5 LB: > { %s1340_s23 = sadd.s32 4294967295, %s1604_s22   ;;  %s1341_s24 = sadd.s32 4294967294, %s1604_s22   ;;  %s1604_s22 = sphi %s1657_s22, %s17_s22   ;;  %s1600_s21 = sphi %s1655_s21, %s2525_s21   ;;  %s1596_s20 = sphi %s1653_s20, %s2524_s20   ;;  %s1592_s19 = sphi %s1651_s19, %s2523_s19   ;;  %s1588_s18 = sphi %s1649_s18, %s2522_s18   ;;  %s1584_s17 = sphi %s1647_s17, %s2521_s17   ;;  %s1580_s16 = sphi %s1645_s16, %s2520_s16   ;;  %s1576_s15 = sphi %s1643_s15, %s2519_s15  }
   0x6   : > { %s26_s25 = sadd.s32 1, %s1596_s20  ;;  %s29_s26 = sadd.s32 1, %s1600_s21 }
   0x7   : > { %p27_p0 = scmp.ge.s32.totalorder %s26_s25, 2  ;;  %p148_p1 = scmp.ne.s32.totalorder %s1584_s17, %s1580_s16 }
   0x8   : > { %p149_p2 = scmp.eq.s32.totalorder %s1340_s23, 3  ;;  %p154_p5 = scmp.ne.s32.totalorder %s1580_s16, %s1576_s15 }
   0x9   : > { %s2527_s25 = smov (%p27_p0, %s26_s25), 0  ;;  %s2529_s26 = smov (!%p27_p0, %s29_s26), %s1600_s21 }
   0xa   : > { %s134_s27 = ssub.s32 %s1596_s20, %s2527_s25  ;;  %p1694_p3 = por %p149_p2, %p148_p1 }
   0xb   : > { %p31_p4 = scmp.ge.s32.totalorder %s2529_s26, 2  ;;  %p155_p6 = scmp.eq.s32.totalorder %s1341_s24, 3 }
   0xc   : > { %p1344_p7 = scmp.ge.s32.totalorder %s1604_s22, 1  ;;  %p209_p9 = scmp.lt.s32.totalorder %s1604_s22, 5 }
   0xd   : > { %s2531_s26 = smov (%p31_p4, %s2529_s26), 0  ;;  %p1703_p8 = por %p155_p6, %p154_p5 }
   0xe   : > { %s133_s30 = ssub.s32 %s1600_s21, %s2531_s26  ;;  %s138_s5 = sadd.s32 1, %s1584_s17 }
   0xf   : > { %s135_s6 = sor.u32 %s134_s27, %s133_s30  ;;  %p210_p10 = pnand %p1344_p7, %p209_p9 }
  0x10   : > { %p136_p11 = scmp.eq.s32.totalorder %s135_s6, 0  ;;  %s1715_s8 = sshll.u32 (!%p210_p10), %s1588_s18, 3 }
  0x11   : > { %213 = sbr.rel (%p210_p10) target bundleno = 718 (0x2ce), region = 36  ;;  %p252_p12 = scmp.lt.s32.totalorder (!%p210_p10), %s1592_s19, 1 }
  0x12   : > { %s1712_s7 = scalar_select %p136_p11, %s1584_s17, %s138_s5  }
  0x13   : > { %p254_p13 = scmp.lt.s32.totalorder (!%p210_p10), %s1715_s8, 23  ;;  %s1606_s30 = smov (!%p210_p10), 4  }
  0x14   : > { %s1373_s5 = sadd.s32 (!%p210_p10), 8, %s1715_s8  ;;  %s1609_s23 = smov (!%p210_p10), 16  }
  0x15   : > { %p266_p0 = scmp.lt.s32.totalorder (!%p210_p10), %s1373_s5, 23  ;;  %s1610_s24 = smov (!%p210_p10), 20  }
  0x16   : > { %s1720_s9 = scalar_select %p252_p12, %s1592_s19, 1  ;;  %vm305_vm0 = vcmask 31744   ;;  %v1613_v27 = vmov 0.0   ;;  %vm422_vm1 = vcmask 57376   ;;  %vm2453_vm2 = vcmask 64545  }
  0x17   : > { %s255_s10 = scalar_select %p254_p13, %s1715_s8, 23  ;;  %1391 = vmatprep.subr.mxu0 %v1613_v27  ;;  %vm420_vm3 = vcmask 64544   ;;  %vm517_vm4 = vcmask 97346   ;;  %vm2459_vm5 = vcmask 91200   ;;  %vm519_vm6 = vcmask 97344  }
  0x18   : > { %s1427_s11 = smul.u32 72, %s1720_s9  ;;  %s2533_s5 = smov (!%p266_p0, %s1373_s5), 23  ;;  %vm594_vm7 = vcmask 130144   ;;  %vm2455_vm8 = vcmask 162944   ;;  %vm2454_vm9 = vcmask 162945   ;;  %vm2457_vm10 = vcmask 195746  }
  0x19   : > { %s1426_s12 = smul.u32 3, %s255_s10  ;;  %vm2458_vm11 = vcmask 155776   ;;  %vm787_vm12 = vcmask 189600   ;;  %vm2451_vm13 = vcmask 195744   ;;  %vm2450_vm14 = vcmask 228544   ;;  %s248_s9 = sand.u32 1, %s1580_s16  }
  0x1a   : > { %s1428_s6 = smul.u32 3, %s2533_s5  ;;  %s1611_s5 = smov 24   ;;  %vm952_vm15 = vcmask 261344  }
  0x1b   : > { %s258_s13 = sadd.s32 %s1427_s11, %s1426_s12  ;;  %s1607_s12 = smov 8  }
  0x1c   : > { %s1347_s14 = sshll.u32 %s258_s13, 3  ;;  %s270_s8 = sadd.s32 %s1428_s6, %s1427_s11 }
  0x1d   : > { %s1729_s27 = scalar_lea.vmem %s2445_s0, %s1347_s14  ;;  %s1349_s10 = sshll.u32 %s270_s8, 3 }
  0x1e   : > { %v1732_v0 = vld [vmem:[%s1729_s27 + $0x10] sm:$0x3]  ;;  %v1735_v1 = vld [vmem:[%s1729_s27] sm:$0xff]  ;;  %v1738_v2 = vld [vmem:[%s1729_s27 + $0x18] sm:$0xff]  ;;  %s272_s13 = scalar_lea.vmem %s2446_s1, %s1349_s10  ;;  %s1608_s14 = smov 12  }
  0x1f   : > { %350 = vrot.lane.b32.xlu1 %v1732_v0, %s1606_s30  ;;  %346 = vrot.lane.b32.xlu0 %v1735_v1, %s1606_s30  ;;  %v1745_v3 = vld [vmem:[%s1729_s27 + $0x8] sm:$0xff]  ;;  %306 = vst.msk [vmem:[#allocation2] sm:$0xff] %vm305_vm0, %v1735_v1  ;;  %308 = vst.msk [vmem:[#allocation2 + $0x10] sm:$0xff] %vm305_vm0, %v1738_v2  ;;  %v1752_v4 = vld [vmem:[%s1729_s27 + $0x20] sm:$0xff]  ;;  %s1612_s6 = smov 28   ;;  %s1614_s8 = smov 32  }
  0x20   : > { %v1755_v5 = vld [vmem:[%s1729_s27 + $0x38] sm:$0xff]  ;;  %v1758_v6 = vld [vmem:[%s1729_s27 + $0x30] sm:$0xff]  ;;  %307 = vst.msk [vmem:[#allocation2 + $0x8] sm:$0xff] %vm305_vm0, %v1745_v3  ;;  %v1763_v7 = vld [vmem:[%s1729_s27 + $0x48] sm:$0xff]  ;;  %s1345_s11 = sshll.u32 %s248_s9, 3 }
  0x21   : > { %309 = vst.msk [vmem:[#allocation2 + $0x18] sm:$0xff] %vm305_vm0, %v1752_v4  ;;  %310 = vst.msk [vmem:[#allocation2 + $0x20] sm:$0xff] %vm305_vm0, %v1758_v6  ;;  %v1772_v8 = vld [vmem:[%s1729_s27 + $0x50] sm:$0xff]  ;;  %v1778_v10 = vld [vmem:[%s1729_s27 + $0xa8] sm:$0xff] }
  0x22   : > { %311 = vst.msk [vmem:[#allocation2 + $0x28] sm:$0xff] %vm305_vm0, %v1755_v5  ;;  %v1775_v9 = vld [vmem:[%s1729_s27 + $0xb0] sm:$0xff]  ;;  %312 = vst.msk [vmem:[#allocation2 + $0x30] sm:$0xff] %vm305_vm0, %v1763_v7  ;;  %v1796_v12 = vld [vmem:[%s1729_s27 + $0x28] sm:$0x3] }
  0x23   : > { %352 = vrot.lane.b32.xlu1 %v1738_v2, %s1606_s30  ;;  %348 = vrot.lane.b32.xlu0 %v1745_v3, %s1606_s30  ;;  %v1787_v11 = vld [vmem:[%s1729_s27 + $0x90] sm:$0xff]  ;;  %313 = vst.msk [vmem:[#allocation2 + $0x38] sm:$0xff] %vm305_vm0, %v1772_v8  ;;  %320 = vst.msk [vmem:[#allocation2 + $0x70] sm:$0xff] %vm305_vm0, %v1778_v10  ;;  %v1799_v13 = vld [vmem:[%s1729_s27 + $0x98] sm:$0xff] }
  0x24   : > { %321 = vst.msk [vmem:[#allocation2 + $0x78] sm:$0xff] %vm305_vm0, %v1775_v9  ;;  %v1802_v14 = vld [vmem:[%s1729_s27 + $0x78] sm:$0xff]  ;;  %318 = vst.msk [vmem:[#allocation2 + $0x60] sm:$0xff] %vm305_vm0, %v1787_v11  ;;  %v1815_v15 = vld [vmem:[%s1729_s27 + $0x80] sm:$0xff] }
  0x25   : > { %316 = vst.msk [vmem:[#allocation2 + $0x50] sm:$0xff] %vm305_vm0, %v1802_v14  ;;  %319 = vst.msk [vmem:[#allocation2 + $0x68] sm:$0xff] %vm305_vm0, %v1799_v13  ;;  %v1825_v16 = vld [vmem:[%s1729_s27 + $0x40] sm:$0x3]  ;;  %v1832_v17 = vld [vmem:[%s1729_s27 + $0x58] sm:$0x3] }
  0x26   : > { %317 = vst.msk [vmem:[#allocation2 + $0x58] sm:$0xff] %vm305_vm0, %v1815_v15  ;;  %v1839_v18 = vld [vmem:[%s1729_s27 + $0x60] sm:$0xff]  ;;  %v1850_v19 = vld [vmem:[%s1729_s27 + $0xb8] sm:$0x3]  ;;  %v1853_v20 = vld [vmem:[%s1729_s27 + $0x68] sm:$0xff] }
  0x27   : > { %356 = vrot.lane.b32.xlu1 %v1796_v12, %s1606_s30  ;;  %354 = vrot.lane.b32.xlu0 %v1752_v4, %s1606_s30  ;;  %314 = vst.msk [vmem:[#allocation2 + $0x40] sm:$0xff] %vm305_vm0, %v1839_v18  ;;  %315 = vst.msk [vmem:[#allocation2 + $0x48] sm:$0xff] %vm305_vm0, %v1853_v20  ;;  %v300_v21 = vld [vmem:[%s272_s13 + $0x8] sm:$0xff]  ;;  %v1868_v22 = vld [vmem:[%s272_s13] sm:$0xff]  ;;  %vm2452_vm0 = vcmask 261345  }
  0x28   : > { %v301_v23 = vld [vmem:[%s272_s13 + $0x10] sm:$0x3]  ;;  %v303_v24 = vld [vmem:[%s272_s13 + $0x20] sm:$0xff]  ;;  %v302_v25 = vld [vmem:[%s272_s13 + $0x18] sm:$0xff] }
  0x29   : > { %v304_v26 = vld [vmem:[%s272_s13 + $0x28] sm:$0x3]  ;;  %v1892_v28 = vld [vmem:[%s1729_s27 + $0xa0] sm:$0x3]  ;;  %v2000_v50 = vld [vmem:[%s1729_s27 + $0x70] sm:$0x3] }
  0x2a   : > { %v1933_v29 = vld [vmem:[%s1729_s27 + $0x88] sm:$0x3]  ;;  %s1368_s13 = sshll.u32 %s1592_s19, 1 }
  0x2b   : > { %360 = vrot.lane.b32.xlu1 %v1755_v5, %s1606_s30  ;;  %358 = vrot.lane.b32.xlu0 %v1758_v6, %s1606_s30 }
  0x2f   : > { %364 = vrot.lane.b32.xlu1 %v1763_v7, %s1606_s30  ;;  %362 = vrot.lane.b32.xlu0 %v1825_v16, %s1606_s30 }
  0x33   : > { %368 = vrot.lane.b32.xlu1 %v1832_v17, %s1606_s30  ;;  %366 = vrot.lane.b32.xlu0 %v1772_v8, %s1606_s30 }
  0x37   : > { %390 = vrot.lane.b32.xlu1 %v1775_v9, %s1606_s30  ;;  %388 = vrot.lane.b32.xlu0 %v1778_v10, %s1606_s30 }
  0x3b   : > { %487 = vrot.lane.b32.xlu1 %v1778_v10, %s1607_s12  ;;  %392 = vrot.lane.b32.xlu0 %v1850_v19, %s1606_s30 }
  0x3f   : > { %491 = vrot.lane.b32.xlu1 %v1850_v19, %s1607_s12  ;;  %489 = vrot.lane.b32.xlu0 %v1775_v9, %s1607_s12 }
  0x43   : > { %576 = vrot.lane.b32.xlu1 %v300_v21, %s1608_s14  ;;  %574 = vrot.lane.b32.xlu0 %v1868_v22, %s1608_s14 }
  0x47   : > { %656 = vrot.lane.b32.xlu1 %v300_v21, %s1609_s23  ;;  %654 = vrot.lane.b32.xlu0 %v1868_v22, %s1609_s23 }
  0x4b   : > { %753 = vrot.lane.b32.xlu1 %v1868_v22, %s1610_s24  ;;  %658 = vrot.lane.b32.xlu0 %v301_v23, %s1609_s23 }
  0x4f   : > { %757 = vrot.lane.b32.xlu1 %v301_v23, %s1610_s24  ;;  %755 = vrot.lane.b32.xlu0 %v300_v21, %s1610_s24 }
  0x53   : > { %842 = vrot.lane.b32.xlu1 %v303_v24, %s1611_s5  ;;  %840 = vrot.lane.b32.xlu0 %v302_v25, %s1611_s5 }
  0x57   : > { %922 = vrot.lane.b32.xlu1 %v303_v24, %s1612_s6  ;;  %920 = vrot.lane.b32.xlu0 %v302_v25, %s1612_s6 }
  0x5b   : > { %1021 = vrot.lane.b32.xlu1 %v303_v24, %s1614_s8  ;;  %924 = vrot.lane.b32.xlu0 %v304_v26, %s1612_s6 }
  0x5f   : > { %382 = vrot.lane.b32.xlu1 %v1787_v11, %s1606_s30  ;;  %1023 = vrot.lane.b32.xlu0 %v304_v26, %s1614_s8 }
  0x63   : > { %386 = vrot.lane.b32.xlu1 %v1892_v28, %s1606_s30  ;;  %384 = vrot.lane.b32.xlu0 %v1799_v13, %s1606_s30 }
  0x67   : > { %483 = vrot.lane.b32.xlu1 %v1799_v13, %s1607_s12  ;;  %481 = vrot.lane.b32.xlu0 %v1787_v11, %s1607_s12 }
  0x6b   : > { %570 = vrot.lane.b32.xlu1 %v1778_v10, %s1608_s14  ;;  %485 = vrot.lane.b32.xlu0 %v1892_v28, %s1607_s12 }
  0x6f   : > { %648 = vrot.lane.b32.xlu1 %v1778_v10, %s1609_s23  ;;  %572 = vrot.lane.b32.xlu0 %v1775_v9, %s1608_s14 }
  0x73   : > { %652 = vrot.lane.b32.xlu1 %v1850_v19, %s1609_s23  ;;  %650 = vrot.lane.b32.xlu0 %v1775_v9, %s1609_s23 }
  0x77   : > { %747 = vrot.lane.b32.xlu1 %v1778_v10, %s1610_s24  ;;  %1019 = vrot.lane.b32.xlu0 %v302_v25, %s1614_s8 }
  0x7b   : > { %751 = vrot.lane.b32.xlu1 %v1850_v19, %s1610_s24  ;;  %749 = vrot.lane.b32.xlu0 %v1775_v9, %s1610_s24 }
  0x7f   : > { %838 = vrot.lane.b32.xlu1 %v300_v21, %s1611_s5  ;;  %836 = vrot.lane.b32.xlu0 %v1868_v22, %s1611_s5 }
  0x83   : > { %916 = vrot.lane.b32.xlu1 %v300_v21, %s1612_s6  ;;  %914 = vrot.lane.b32.xlu0 %v1868_v22, %s1612_s6 }
  0x87   : > { %1015 = vrot.lane.b32.xlu1 %v300_v21, %s1614_s8  ;;  %918 = vrot.lane.b32.xlu0 %v301_v23, %s1612_s6 }
  0x8b   : > { %376 = vrot.lane.b32.xlu1 %v1802_v14, %s1606_s30  ;;  %1017 = vrot.lane.b32.xlu0 %v301_v23, %s1614_s8 }
  0x8f   : > { %380 = vrot.lane.b32.xlu1 %v1933_v29, %s1606_s30  ;;  %378 = vrot.lane.b32.xlu0 %v1815_v15, %s1606_s30 }
  0x91   : > { %v351_v30 = vpop.permute.xlu1 %350  ;;  %v347_v31 = vpop.permute.xlu0 %346 }
  0x92   : > { %423 = vst.msk [vmem:[#allocation2 + $0xf] sm:$0x1] %vm422_vm1, %v351_v30 }
  0x93   : > { %419 = vst.msk [vmem:[#allocation2 - $0x1] sm:$0xfe] %vm2453_vm2, %v347_v31  ;;  %477 = vrot.lane.b32.xlu1 %v1815_v15, %s1607_s12  ;;  %475 = vrot.lane.b32.xlu0 %v1802_v14, %s1607_s12 }
  0x95   : > { %v353_v32 = vpop.permute.xlu1 %352  ;;  %v349_v33 = vpop.permute.xlu0 %348 }
  0x96   : > { %424 = vst.msk [vmem:[#allocation2 + $0xf] sm:$0xfe] %vm2453_vm2, %v353_v32 }
  0x97   : > { %421 = vst.msk [vmem:[#allocation2 + $0x7] sm:$0xff] %vm420_vm3, %v349_v33  ;;  %566 = vrot.lane.b32.xlu1 %v1787_v11, %s1608_s14  ;;  %479 = vrot.lane.b32.xlu0 %v1933_v29, %s1607_s12 }
  0x99   : > { %v357_v34 = vpop.permute.xlu1 %356  ;;  %v355_v35 = vpop.permute.xlu0 %354 }
  0x9a   : > { %426 = vst.msk [vmem:[#allocation2 + $0x1f] sm:$0x1] %vm422_vm1, %v357_v34 }
  0x9b   : > { %425 = vst.msk [vmem:[#allocation2 + $0x17] sm:$0xff] %vm420_vm3, %v355_v35  ;;  %642 = vrot.lane.b32.xlu1 %v1787_v11, %s1609_s23  ;;  %568 = vrot.lane.b32.xlu0 %v1799_v13, %s1608_s14 }
  0x9d   : > { %v361_v36 = vpop.permute.xlu1 %360  ;;  %v359_v37 = vpop.permute.xlu0 %358 }
  0x9e   : > { %428 = vst.msk [vmem:[#allocation2 + $0x27] sm:$0xff] %vm420_vm3, %v361_v36 }
  0x9f   : > { %427 = vst.msk [vmem:[#allocation2 + $0x1f] sm:$0xfe] %vm2453_vm2, %v359_v37  ;;  %646 = vrot.lane.b32.xlu1 %v1892_v28, %s1609_s23  ;;  %644 = vrot.lane.b32.xlu0 %v1799_v13, %s1609_s23 }
  0xa1   : > { %v365_v38 = vpop.permute.xlu1 %364  ;;  %v363_v39 = vpop.permute.xlu0 %362 }
  0xa2   : > { %430 = vst.msk [vmem:[#allocation2 + $0x2f] sm:$0xfe] %vm2453_vm2, %v365_v38 }
  0xa3   : > { %429 = vst.msk [vmem:[#allocation2 + $0x2f] sm:$0x1] %vm422_vm1, %v363_v39  ;;  %741 = vrot.lane.b32.xlu1 %v1787_v11, %s1610_s24  ;;  %1013 = vrot.lane.b32.xlu0 %v1868_v22, %s1614_s8 }
  0xa5   : > { %v369_v40 = vpop.permute.xlu1 %368  ;;  %v367_v41 = vpop.permute.xlu0 %366 }
  0xa6   : > { %432 = vst.msk [vmem:[#allocation2 + $0x3f] sm:$0x1] %vm422_vm1, %v369_v40 }
  0xa7   : > { %431 = vst.msk [vmem:[#allocation2 + $0x37] sm:$0xff] %vm420_vm3, %v367_v41  ;;  %745 = vrot.lane.b32.xlu1 %v1892_v28, %s1610_s24  ;;  %743 = vrot.lane.b32.xlu0 %v1799_v13, %s1610_s24 }
  0xa9   : > { %v391_v42 = vpop.permute.xlu1 %390  ;;  %v389_v43 = vpop.permute.xlu0 %388 }
  0xaa   : > { %443 = vst.msk [vmem:[#allocation2 + $0x77] sm:$0xff] %vm420_vm3, %v391_v42 }
  0xab   : > { %442 = vst.msk [vmem:[#allocation2 + $0x6f] sm:$0xfe] %vm2453_vm2, %v389_v43  ;;  %834 = vrot.lane.b32.xlu1 %v1775_v9, %s1611_s5  ;;  %832 = vrot.lane.b32.xlu0 %v1778_v10, %s1611_s5 }
  0xad   : > { %v488_v44 = vpop.permute.xlu1 %487  ;;  %v393_v45 = vpop.permute.xlu0 %392 }
  0xae   : > { %541 = vst.msk [vmem:[#allocation2 + $0x6e] sm:$0xfc] %vm517_vm4, %v488_v44 }
  0xaf   : > { %444 = vst.msk [vmem:[#allocation2 + $0x7f] sm:$0x1] %vm422_vm1, %v393_v45  ;;  %910 = vrot.lane.b32.xlu1 %v1775_v9, %s1612_s6  ;;  %908 = vrot.lane.b32.xlu0 %v1778_v10, %s1612_s6 }
  0xb1   : > { %v492_v46 = vpop.permute.xlu1 %491  ;;  %v490_v47 = vpop.permute.xlu0 %489 }
  0xb2   : > { %543 = vst.msk [vmem:[#allocation2 + $0x7e] sm:$0x3] %vm2459_vm5, %v492_v46 }
  0xb3   : > { %542 = vst.msk [vmem:[#allocation2 + $0x76] sm:$0xff] %vm519_vm6, %v490_v47  ;;  %1009 = vrot.lane.b32.xlu1 %v1775_v9, %s1614_s8  ;;  %912 = vrot.lane.b32.xlu0 %v1850_v19, %s1612_s6 }
  0xb5   : > { %v577_v48 = vpop.permute.xlu1 %576  ;;  %v575_v49 = vpop.permute.xlu0 %574 }
  0xb6   : > { %610 = vst.msk [vmem:[#allocation2 + $0x78] sm:$0xff] %vm594_vm7, %v577_v48  ;;  %609 = vst.msk [vmem:[#allocation2 + $0x70] sm:$0xff] %vm594_vm7, %v575_v49 }
  0xb7   : > { %370 = vrot.lane.b32.xlu1 %v1839_v18, %s1606_s30  ;;  %1011 = vrot.lane.b32.xlu0 %v1850_v19, %s1614_s8 }
  0xb9   : > { %v657_v51 = vpop.permute.xlu1 %656  ;;  %v655_v52 = vpop.permute.xlu0 %654 }
  0xba   : > { %709 = vst.msk [vmem:[#allocation2 + $0x77] sm:$0xff] %vm2455_vm8, %v657_v51 }
  0xbb   : > { %708 = vst.msk [vmem:[#allocation2 + $0x6f] sm:$0xfe] %vm2454_vm9, %v655_v52  ;;  %374 = vrot.lane.b32.xlu1 %v2000_v50, %s1606_s30  ;;  %372 = vrot.lane.b32.xlu0 %v1853_v20, %s1606_s30  ;;  %s1223_s30 = scalar_lea.sflag [#allocation4], %s248_s9 }
  0xbd   : > { %v754_v53 = vpop.permute.xlu1 %753  ;;  %v659_v54 = vpop.permute.xlu0 %658 }
  0xbe   : > { %807 = vst.msk [vmem:[#allocation2 + $0x6e] sm:$0xfc] %vm2457_vm10, %v754_v53 }
  0xbf   : > { %710 = vst.msk [vmem:[#allocation2 + $0x7f] sm:$0x1] %vm2458_vm11, %v659_v54  ;;  %471 = vrot.lane.b32.xlu1 %v1853_v20, %s1607_s12  ;;  %469 = vrot.lane.b32.xlu0 %v1839_v18, %s1607_s12 }
  0xc1   : > { %v758_v55 = vpop.permute.xlu1 %757  ;;  %v756_v56 = vpop.permute.xlu0 %755 }
  0xc2   : > { %809 = vst.msk [vmem:[#allocation2 + $0x7e] sm:$0x3] %vm787_vm12, %v758_v55 }
  0xc3   : > { %808 = vst.msk [vmem:[#allocation2 + $0x76] sm:$0xff] %vm2451_vm13, %v756_v56  ;;  %562 = vrot.lane.b32.xlu1 %v1802_v14, %s1608_s14  ;;  %473 = vrot.lane.b32.xlu0 %v2000_v50, %s1607_s12  ;;  %vm954_vm13 = vcmask 254176  }
  0xc5   : > { %v843_v57 = vpop.permute.xlu1 %842  ;;  %v841_v58 = vpop.permute.xlu0 %840 }
  0xc6   : > { %876 = vst.msk [vmem:[#allocation2 + $0x78] sm:$0xff] %vm2450_vm14, %v843_v57  ;;  %875 = vst.msk [vmem:[#allocation2 + $0x70] sm:$0xff] %vm2450_vm14, %v841_v58  ;;  %vm1051_vm14 = vcmask 294144  }
  0xc7   : > { %636 = vrot.lane.b32.xlu1 %v1802_v14, %s1609_s23  ;;  %564 = vrot.lane.b32.xlu0 %v1815_v15, %s1608_s14 }
  0xc9   : > { %v923_v59 = vpop.permute.xlu1 %922  ;;  %v921_v60 = vpop.permute.xlu0 %920 }
  0xca   : > { %975 = vst.msk [vmem:[#allocation2 + $0x77] sm:$0xff] %vm952_vm15, %v923_v59 }
  0xcb   : > { %974 = vst.msk [vmem:[#allocation2 + $0x6f] sm:$0xfe] %vm2452_vm0, %v921_v60  ;;  %640 = vrot.lane.b32.xlu1 %v1933_v29, %s1609_s23  ;;  %638 = vrot.lane.b32.xlu0 %v1815_v15, %s1609_s23  ;;  %vm1053_vm0 = vcmask 288000  }
  0xcd   : > { %v1022_v61 = vpop.permute.xlu1 %1021  ;;  %v925_v62 = vpop.permute.xlu0 %924 }
  0xce   : > { %1074 = vst.msk [vmem:[#allocation2 + $0x76] sm:$0xff] %vm1051_vm14, %v1022_v61 }
  0xcf   : > { %976 = vst.msk [vmem:[#allocation2 + $0x7f] sm:$0x1] %vm954_vm13, %v925_v62  ;;  %735 = vrot.lane.b32.xlu1 %v1802_v14, %s1610_s24  ;;  %1007 = vrot.lane.b32.xlu0 %v1778_v10, %s1614_s8 }
  0xd1   : > { %v383_v63 = vpop.permute.xlu1 %382  ;;  %v1024_v9 = vpop.permute.xlu0 %1023 }
  0xd2   : > { %439 = vst.msk [vmem:[#allocation2 + $0x5f] sm:$0xfe] %vm2453_vm2, %v383_v63  ;;  %vm1099_vm2 = vcmask 293888  }
  0xd3   : > { %1075 = vst.msk [vmem:[#allocation2 + $0x7e] sm:$0x3] %vm1053_vm0, %v1024_v9  ;;  %739 = vrot.lane.b32.xlu1 %v1933_v29, %s1610_s24  ;;  %737 = vrot.lane.b32.xlu0 %v1815_v15, %s1610_s24 }
  0xd5   : > { %v387_v19 = vpop.permute.xlu1 %386  ;;  %v385_v21 = vpop.permute.xlu0 %384 }
  0xd6   : > { %441 = vst.msk [vmem:[#allocation2 + $0x6f] sm:$0x1] %vm422_vm1, %v387_v19 }
  0xd7   : > { %440 = vst.msk [vmem:[#allocation2 + $0x67] sm:$0xff] %vm420_vm3, %v385_v21  ;;  %830 = vrot.lane.b32.xlu1 %v1799_v13, %s1611_s5  ;;  %828 = vrot.lane.b32.xlu0 %v1787_v11, %s1611_s5 }
  0xd9   : > { %v484_v10 = vpop.permute.xlu1 %483  ;;  %v482_v22 = vpop.permute.xlu0 %481 }
  0xda   : > { %v1091_v23 = vld [vmem:[#allocation2 + $0x78] sm:$0xff]  ;;  %539 = vst.msk [vmem:[#allocation2 + $0x66] sm:$0xff] %vm519_vm6, %v484_v10 }
  0xdb   : > { %538 = vst.msk [vmem:[#allocation2 + $0x5e] sm:$0xfc] %vm517_vm4, %v482_v22  ;;  %1392 = vmatpush3.xpose.msk.msra.mxu0 %vm1099_vm2, %v1091_v23  ;;  %904 = vrot.lane.b32.xlu1 %v1799_v13, %s1612_s6 }
  0xdc   : > { %902 = vrot.lane.b32.xlu0 %v1787_v11, %s1612_s6  ;;  %1393 = vmatprep.subr.mxu0 %v1613_v27 }
  0xdd   : > { %v571_v24 = vpop.permute.xlu1 %570  ;;  %v486_v25 = vpop.permute.xlu0 %485 }
  0xde   : > { %607 = vst.msk [vmem:[#allocation2 + $0x60] sm:$0xff] %vm594_vm7, %v571_v24 }
  0xdf   : > { %540 = vst.msk [vmem:[#allocation2 + $0x6e] sm:$0x3] %vm2459_vm5, %v486_v25  ;;  %1003 = vrot.lane.b32.xlu1 %v1799_v13, %s1614_s8 }
  0xe0   : > { %906 = vrot.lane.b32.xlu0 %v1892_v28, %s1612_s6 }
  0xe1   : > { %v649_v26 = vpop.permute.xlu1 %648  ;;  %v573_v30 = vpop.permute.xlu0 %572 }
  0xe2   : > { %705 = vst.msk [vmem:[#allocation2 + $0x5f] sm:$0xfe] %vm2454_vm9, %v649_v26  ;;  %vm2456_vm9 = vcmask 294146  }
  0xe3   : > { %608 = vst.msk [vmem:[#allocation2 + $0x68] sm:$0xff] %vm594_vm7, %v573_v30  ;;  %463 = vrot.lane.b32.xlu1 %v1763_v7, %s1607_s12 }
  0xe4   : > { %1005 = vrot.lane.b32.xlu0 %v1892_v28, %s1614_s8 }
  0xe5   : > { %v653_v31 = vpop.permute.xlu1 %652  ;;  %v651_v32 = vpop.permute.xlu0 %650 }
  0xe6   : > { %707 = vst.msk [vmem:[#allocation2 + $0x6f] sm:$0x1] %vm2458_vm11, %v653_v31 }
  0xe7   : > { %706 = vst.msk [vmem:[#allocation2 + $0x67] sm:$0xff] %vm2455_vm8, %v651_v32  ;;  %467 = vrot.lane.b32.xlu1 %v1832_v17, %s1607_s12  ;;  %vm2462_vm8 = vcmask 195744  }
  0xe8   : > { %465 = vrot.lane.b32.xlu0 %v1772_v8, %s1607_s12 }
  0xe9   : > { %v748_v13 = vpop.permute.xlu1 %747  ;;  %v1020_v33 = vpop.permute.xlu0 %1019 }
  0xea   : > { %804 = vst.msk [vmem:[#allocation2 + $0x5e] sm:$0xfc] %vm2457_vm10, %v748_v13 }
  0xeb   : > { %1073 = vst.msk [vmem:[#allocation2 + $0x6e] sm:$0xfc] %vm2456_vm9, %v1020_v33  ;;  %560 = vrot.lane.b32.xlu1 %v1853_v20, %s1608_s14  ;;  %vm2463_vm9 = vcmask 228544  }
  0xec   : > { %558 = vrot.lane.b32.xlu0 %v1839_v18, %s1608_s14  ;;  %vm2464_vm10 = vmmov %vm2463_vm9 }
  0xed   : > { %v752_v28 = vpop.permute.xlu1 %751  ;;  %v750_v34 = vpop.permute.xlu0 %749 }
  0xee   : > { %806 = vst.msk [vmem:[#allocation2 + $0x6e] sm:$0x3] %vm787_vm12, %v752_v28 }
  0xef   : > { %805 = vst.msk [vmem:[#allocation2 + $0x66] sm:$0xff] %vm2462_vm8, %v750_v34  ;;  %632 = vrot.lane.b32.xlu1 %v1853_v20, %s1609_s23  ;;  %vm2465_vm8 = vcmask 261345  }
  0xf0   : > { %630 = vrot.lane.b32.xlu0 %v1839_v18, %s1609_s23 }
  0xf1   : > { %v839_v35 = vpop.permute.xlu1 %838  ;;  %v837_v36 = vpop.permute.xlu0 %836 }
  0xf2   : > { %v1090_v37 = vld [vmem:[#allocation2 + $0x70] sm:$0xff]  ;;  %874 = vst.msk [vmem:[#allocation2 + $0x68] sm:$0xff] %vm2463_vm9, %v839_v35  ;;  %vm2466_vm9 = vcmask 64545  }
  0xf3   : > { %873 = vst.msk [vmem:[#allocation2 + $0x60] sm:$0xff] %vm2464_vm10, %v837_v36  ;;  %1394 = vmatpush3.xpose.msk.msra.mxu0 %vm1099_vm2, %v1090_v37  ;;  %1001 = vrot.lane.b32.xlu1 %v1787_v11, %s1614_s8  ;;  %vm2467_vm10 = vcmask 162945  }
  0xf4   : > { %634 = vrot.lane.b32.xlu0 %v2000_v50, %s1609_s23  ;;  %1395 = vmatprep.subr.mxu0 %v1613_v27 }
  0xf5   : > { %v917_v38 = vpop.permute.xlu1 %916  ;;  %v915_v39 = vpop.permute.xlu0 %914 }
  0xf6   : > { %972 = vst.msk [vmem:[#allocation2 + $0x67] sm:$0xff] %vm952_vm15, %v917_v38 }
  0xf7   : > { %971 = vst.msk [vmem:[#allocation2 + $0x5f] sm:$0xfe] %vm2465_vm8, %v915_v39  ;;  %731 = vrot.lane.b32.xlu1 %v1853_v20, %s1610_s24  ;;  %vm2468_vm8 = vcmask 162944  }
  0xf8   : > { %729 = vrot.lane.b32.xlu0 %v1839_v18, %s1610_s24 }
  0xf9   : > { %v1016_v40 = vpop.permute.xlu1 %1015  ;;  %v919_v41 = vpop.permute.xlu0 %918 }
  0xfa   : > { %1071 = vst.msk [vmem:[#allocation2 + $0x66] sm:$0xff] %vm1051_vm14, %v1016_v40 }
  0xfb   : > { %973 = vst.msk [vmem:[#allocation2 + $0x6f] sm:$0x1] %vm954_vm13, %v919_v41  ;;  %824 = vrot.lane.b32.xlu1 %v1802_v14, %s1611_s5 }
  0xfc   : > { %733 = vrot.lane.b32.xlu0 %v2000_v50, %s1610_s24 }
  0xfd   : > { %v377_v11 = vpop.permute.xlu1 %376  ;;  %v1018_v42 = vpop.permute.xlu0 %1017 }
  0xfe   : > { %436 = vst.msk [vmem:[#allocation2 + $0x4f] sm:$0xfe] %vm2466_vm9, %v377_v11  ;;  %vm2469_vm9 = vcmask 195746  }
  0xff   : > { %1072 = vst.msk [vmem:[#allocation2 + $0x6e] sm:$0x3] %vm1053_vm0, %v1018_v42  ;;  %896 = vrot.lane.b32.xlu1 %v1802_v14, %s1612_s6 }
 0x100   : > { %826 = vrot.lane.b32.xlu0 %v1815_v15, %s1611_s5 }
 0x101   : > { %v381_v43 = vpop.permute.xlu1 %380  ;;  %v379_v44 = vpop.permute.xlu0 %378 }
 0x102   : > { %438 = vst.msk [vmem:[#allocation2 + $0x5f] sm:$0x1] %vm422_vm1, %v381_v43 }
 0x103   : > { %437 = vst.msk [vmem:[#allocation2 + $0x57] sm:$0xff] %vm420_vm3, %v379_v44  ;;  %900 = vrot.lane.b32.xlu1 %v1933_v29, %s1612_s6 }
 0x104   : > { %898 = vrot.lane.b32.xlu0 %v1815_v15, %s1612_s6 }
 0x105   : > { %v478_v45 = vpop.permute.xlu1 %477  ;;  %v476_v46 = vpop.permute.xlu0 %475 }
 0x106   : > { %v1089_v47 = vld [vmem:[#allocation2 + $0x68] sm:$0xff]  ;;  %536 = vst.msk [vmem:[#allocation2 + $0x56] sm:$0xff] %vm519_vm6, %v478_v45 }
 0x107   : > { %535 = vst.msk [vmem:[#allocation2 + $0x4e] sm:$0xfc] %vm517_vm4, %v476_v46  ;;  %1396 = vmatpush3.xpose.msk.msra.mxu0 %vm1099_vm2, %v1089_v47  ;;  %999 = vrot.lane.b32.xlu1 %v1933_v29, %s1614_s8 }
 0x108   : > { %997 = vrot.lane.b32.xlu0 %v1815_v15, %s1614_s8  ;;  %1397 = vmatprep.subr.mxu0 %v1613_v27 }
 0x109   : > { %v567_v48 = vpop.permute.xlu1 %566  ;;  %v480_v49 = vpop.permute.xlu0 %479 }
 0x10a   : > { %605 = vst.msk [vmem:[#allocation2 + $0x50] sm:$0xff] %vm594_vm7, %v567_v48 }
 0x10b   : > { %537 = vst.msk [vmem:[#allocation2 + $0x5e] sm:$0x3] %vm2459_vm5, %v480_v49  ;;  %459 = vrot.lane.b32.xlu1 %v1755_v5, %s1607_s12 }
 0x10c   : > { %457 = vrot.lane.b32.xlu0 %v1758_v6, %s1607_s12 }
 0x10d   : > { %v643_v51 = vpop.permute.xlu1 %642  ;;  %v569_v52 = vpop.permute.xlu0 %568 }
 0x10e   : > { %702 = vst.msk [vmem:[#allocation2 + $0x4f] sm:$0xfe] %vm2467_vm10, %v643_v51  ;;  %vm2470_vm10 = vcmask 294146  }
 0x10f   : > { %606 = vst.msk [vmem:[#allocation2 + $0x58] sm:$0xff] %vm594_vm7, %v569_v52  ;;  %554 = vrot.lane.b32.xlu1 %v1763_v7, %s1608_s14 }
 0x110   : > { %461 = vrot.lane.b32.xlu0 %v1825_v16, %s1607_s12 }
 0x111   : > { %v647_v15 = vpop.permute.xlu1 %646  ;;  %v645_v29 = vpop.permute.xlu0 %644 }
 0x112   : > { %704 = vst.msk [vmem:[#allocation2 + $0x5f] sm:$0x1] %vm2458_vm11, %v647_v15  ;;  %v1093_v15 = vld [vmem:[%s2448_s3] sm:$0xff] }
 0x113   : > { %703 = vst.msk [vmem:[#allocation2 + $0x57] sm:$0xff] %vm2468_vm8, %v645_v29  ;;  %624 = vrot.lane.b32.xlu1 %v1763_v7, %s1609_s23  ;;  %vm2471_vm8 = vcmask 195744   ;;  %v1616_v29 = vmov 0  }
 0x114   : > { %556 = vrot.lane.b32.xlu0 %v1772_v8, %s1608_s14 }
 0x115   : > { %v742_v53 = vpop.permute.xlu1 %741  ;;  %v1014_v54 = vpop.permute.xlu0 %1013  ;;  %1511 = vset.pattern.permute.xlu0 %v1616_v29 }
 0x116   : > { %801 = vst.msk [vmem:[#allocation2 + $0x4e] sm:$0xfc] %vm2469_vm9, %v742_v53  ;;  %vm2472_vm9 = vcmask 228544  }
 0x117   : > { %1070 = vst.msk [vmem:[#allocation2 + $0x5e] sm:$0xfc] %vm2470_vm10, %v1014_v54  ;;  %628 = vrot.lane.b32.xlu1 %v1832_v17, %s1609_s23  ;;  %vm2473_vm10 = vmmov %vm2472_vm9 }
 0x118   : > { %626 = vrot.lane.b32.xlu0 %v1772_v8, %s1609_s23 }
 0x119   : > { %v746_v55 = vpop.permute.xlu1 %745  ;;  %v744_v56 = vpop.permute.xlu0 %743 }
 0x11a   : > { %803 = vst.msk [vmem:[#allocation2 + $0x5e] sm:$0x3] %vm787_vm12, %v746_v55 }
 0x11b   : > { %802 = vst.msk [vmem:[#allocation2 + $0x56] sm:$0xff] %vm2471_vm8, %v744_v56  ;;  %723 = vrot.lane.b32.xlu1 %v1763_v7, %s1610_s24  ;;  %vm2474_vm8 = vcmask 261345  }
 0x11c   : > { %995 = vrot.lane.b32.xlu0 %v1802_v14, %s1614_s8 }
 0x11d   : > { %v835_v57 = vpop.permute.xlu1 %834  ;;  %v833_v58 = vpop.permute.xlu0 %832 }
 0x11e   : > { %v1088_v59 = vld [vmem:[#allocation2 + $0x60] sm:$0xff]  ;;  %872 = vst.msk [vmem:[#allocation2 + $0x58] sm:$0xff] %vm2472_vm9, %v835_v57  ;;  %vm2475_vm9 = vcmask 64545  }
 0x11f   : > { %871 = vst.msk [vmem:[#allocation2 + $0x50] sm:$0xff] %vm2473_vm10, %v833_v58  ;;  %1398 = vmatpush3.xpose.msk.msra.mxu0 %vm1099_vm2, %v1088_v59  ;;  %727 = vrot.lane.b32.xlu1 %v1832_v17, %s1610_s24  ;;  %vm2478_vm10 = vcmask 195746  }
 0x120   : > { %725 = vrot.lane.b32.xlu0 %v1772_v8, %s1610_s24  ;;  %1399 = vmatprep.subr.mxu0 %v1613_v27 }
 0x121   : > { %v911_v60 = vpop.permute.xlu1 %910  ;;  %v909_v61 = vpop.permute.xlu0 %908 }
 0x122   : > { %969 = vst.msk [vmem:[#allocation2 + $0x57] sm:$0xff] %vm952_vm15, %v911_v60 }
 0x123   : > { %968 = vst.msk [vmem:[#allocation2 + $0x4f] sm:$0xfe] %vm2474_vm8, %v909_v61  ;;  %822 = vrot.lane.b32.xlu1 %v1853_v20, %s1611_s5  ;;  %vm2479_vm8 = vcmask 294146  }
 0x124   : > { %820 = vrot.lane.b32.xlu0 %v1839_v18, %s1611_s5 }
 0x125   : > { %v1010_v14 = vpop.permute.xlu1 %1009  ;;  %v913_v62 = vpop.permute.xlu0 %912 }
 0x126   : > { %1068 = vst.msk [vmem:[#allocation2 + $0x56] sm:$0xff] %vm1051_vm14, %v1010_v14 }
 0x127   : > { %970 = vst.msk [vmem:[#allocation2 + $0x5f] sm:$0x1] %vm954_vm13, %v913_v62  ;;  %892 = vrot.lane.b32.xlu1 %v1853_v20, %s1612_s6 }
 0x128   : > { %890 = vrot.lane.b32.xlu0 %v1839_v18, %s1612_s6 }
 0x129   : > { %v371_v63 = vpop.permute.xlu1 %370  ;;  %v1012_v9 = vpop.permute.xlu0 %1011 }
 0x12a   : > { %433 = vst.msk [vmem:[#allocation2 + $0x3f] sm:$0xfe] %vm2475_vm9, %v371_v63  ;;  %vm2480_vm9 = vcmask 195744  }
 0x12b   : > { %1069 = vst.msk [vmem:[#allocation2 + $0x5e] sm:$0x3] %vm1053_vm0, %v1012_v9  ;;  %991 = vrot.lane.b32.xlu1 %v1853_v20, %s1614_s8 }
 0x12c   : > { %894 = vrot.lane.b32.xlu0 %v2000_v50, %s1612_s6 }
 0x12d   : > { %v375_v19 = vpop.permute.xlu1 %374  ;;  %v373_v21 = vpop.permute.xlu0 %372 }
 0x12e   : > { %435 = vst.msk [vmem:[#allocation2 + $0x4f] sm:$0x1] %vm422_vm1, %v375_v19  ;;  %vm2476_vm1 = vcmask 162945  }
 0x12f   : > { %434 = vst.msk [vmem:[#allocation2 + $0x47] sm:$0xff] %vm420_vm3, %v373_v21  ;;  %451 = vrot.lane.b32.xlu1 %v1738_v2, %s1607_s12  ;;  %vm2477_vm3 = vcmask 162944  }
 0x130   : > { %993 = vrot.lane.b32.xlu0 %v2000_v50, %s1614_s8 }
 0x131   : > { %v472_v10 = vpop.permute.xlu1 %471  ;;  %v470_v22 = vpop.permute.xlu0 %469 }
 0x132   : > { %v1087_v23 = vld [vmem:[#allocation2 + $0x58] sm:$0xff]  ;;  %533 = vst.msk [vmem:[#allocation2 + $0x46] sm:$0xff] %vm519_vm6, %v472_v10 }
 0x133   : > { %532 = vst.msk [vmem:[#allocation2 + $0x3e] sm:$0xfc] %vm517_vm4, %v470_v22  ;;  %1400 = vmatpush3.xpose.msk.msra.mxu0 %vm1099_vm2, %v1087_v23  ;;  %455 = vrot.lane.b32.xlu1 %v1796_v12, %s1607_s12 }
 0x134   : > { %453 = vrot.lane.b32.xlu0 %v1752_v4, %s1607_s12  ;;  %1401 = vmatprep.subr.mxu0 %v1613_v27 }
 0x135   : > { %v563_v20 = vpop.permute.xlu1 %562  ;;  %v474_v24 = vpop.permute.xlu0 %473 }
 0x136   : > { %603 = vst.msk [vmem:[#allocation2 + $0x40] sm:$0xff] %vm594_vm7, %v563_v20 }
 0x137   : > { %534 = vst.msk [vmem:[#allocation2 + $0x4e] sm:$0x3] %vm2459_vm5, %v474_v24  ;;  %552 = vrot.lane.b32.xlu1 %v1755_v5, %s1608_s14 }
 0x138   : > { %550 = vrot.lane.b32.xlu0 %v1758_v6, %s1608_s14 }
 0x139   : > { %v637_v50 = vpop.permute.xlu1 %636  ;;  %v565_v25 = vpop.permute.xlu0 %564 }
 0x13a   : > { %699 = vst.msk [vmem:[#allocation2 + $0x3f] sm:$0xfe] %vm2476_vm1, %v637_v50  ;;  %vm2481_vm1 = vcmask 228544  }
 0x13b   : > { %604 = vst.msk [vmem:[#allocation2 + $0x48] sm:$0xff] %vm594_vm7, %v565_v25  ;;  %620 = vrot.lane.b32.xlu1 %v1755_v5, %s1609_s23 }
 0x13c   : > { %618 = vrot.lane.b32.xlu0 %v1758_v6, %s1609_s23 }
 0x13d   : > { %v641_v26 = vpop.permute.xlu1 %640  ;;  %v639_v30 = vpop.permute.xlu0 %638 }
 0x13e   : > { %701 = vst.msk [vmem:[#allocation2 + $0x4f] sm:$0x1] %vm2458_vm11, %v641_v26 }
 0x13f   : > { %700 = vst.msk [vmem:[#allocation2 + $0x47] sm:$0xff] %vm2477_vm3, %v639_v30  ;;  %989 = vrot.lane.b32.xlu1 %v1839_v18, %s1614_s8  ;;  %vm2482_vm3 = vmmov %vm2481_vm1 }
 0x140   : > { %622 = vrot.lane.b32.xlu0 %v1825_v16, %s1609_s23 }
 0x141   : > { %v736_v31 = vpop.permute.xlu1 %735  ;;  %v1008_v32 = vpop.permute.xlu0 %1007 }
 0x142   : > { %798 = vst.msk [vmem:[#allocation2 + $0x3e] sm:$0xfc] %vm2478_vm10, %v736_v31  ;;  %vm2483_vm10 = vcmask 261345  }
 0x143   : > { %1067 = vst.msk [vmem:[#allocation2 + $0x4e] sm:$0xfc] %vm2479_vm8, %v1008_v32  ;;  %719 = vrot.lane.b32.xlu1 %v1755_v5, %s1610_s24  ;;  %vm2484_vm8 = vcmask 162944  }
 0x144   : > { %717 = vrot.lane.b32.xlu0 %v1758_v6, %s1610_s24 }
 0x145   : > { %v740_v13 = vpop.permute.xlu1 %739  ;;  %v738_v33 = vpop.permute.xlu0 %737 }
 0x146   : > { %800 = vst.msk [vmem:[#allocation2 + $0x4e] sm:$0x3] %vm787_vm12, %v740_v13 }
 0x147   : > { %799 = vst.msk [vmem:[#allocation2 + $0x46] sm:$0xff] %vm2480_vm9, %v738_v33  ;;  %816 = vrot.lane.b32.xlu1 %v1763_v7, %s1611_s5  ;;  %vm2485_vm9 = vcmask 162945  }
 0x148   : > { %721 = vrot.lane.b32.xlu0 %v1825_v16, %s1610_s24 }
 0x149   : > { %v831_v18 = vpop.permute.xlu1 %830  ;;  %v829_v28 = vpop.permute.xlu0 %828 }
 0x14a   : > { %v1086_v34 = vld [vmem:[#allocation2 + $0x50] sm:$0xff]  ;;  %870 = vst.msk [vmem:[#allocation2 + $0x48] sm:$0xff] %vm2481_vm1, %v831_v18  ;;  %vm2486_vm1 = vcmask 294146  }
 0x14b   : > { %869 = vst.msk [vmem:[#allocation2 + $0x40] sm:$0xff] %vm2482_vm3, %v829_v28  ;;  %1402 = vmatpush3.xpose.msk.msra.mxu0 %vm1099_vm2, %v1086_v34  ;;  %884 = vrot.lane.b32.xlu1 %v1763_v7, %s1612_s6  ;;  %vm2487_vm3 = vcmask 195744  }
 0x14c   : > { %818 = vrot.lane.b32.xlu0 %v1772_v8, %s1611_s5  ;;  %1403 = vmatprep.subr.mxu0 %v1613_v27 }
 0x14d   : > { %v905_v35 = vpop.permute.xlu1 %904 }
 0x14e   : > { %v903_v36 = vpop.permute.xlu0 %902  ;;  %966 = vst.msk [vmem:[#allocation2 + $0x47] sm:$0xff] %vm952_vm15, %v905_v35 }
 0x14f   : > { %965 = vst.msk [vmem:[#allocation2 + $0x3f] sm:$0xfe] %vm2483_vm10, %v903_v36  ;;  %888 = vrot.lane.b32.xlu1 %v1832_v17, %s1612_s6  ;;  %vm2488_vm10 = vcmask 195746  }
 0x150   : > { %886 = vrot.lane.b32.xlu0 %v1772_v8, %s1612_s6 }
 0x151   : > { %v1004_v37 = vpop.permute.xlu1 %1003 }
 0x152   : > { %v907_v38 = vpop.permute.xlu0 %906  ;;  %1065 = vst.msk [vmem:[#allocation2 + $0x46] sm:$0xff] %vm1051_vm14, %v1004_v37 }
 0x153   : > { %967 = vst.msk [vmem:[#allocation2 + $0x4f] sm:$0x1] %vm954_vm13, %v907_v38  ;;  %987 = vrot.lane.b32.xlu1 %v1832_v17, %s1614_s8 }
 0x154   : > { %985 = vrot.lane.b32.xlu0 %v1772_v8, %s1614_s8 }
 0x155   : > { %v464_v39 = vpop.permute.xlu1 %463 }
 0x156   : > { %v1006_v40 = vpop.permute.xlu0 %1005  ;;  %529 = vst.msk [vmem:[#allocation2 + $0x2e] sm:$0xfc] %vm517_vm4, %v464_v39 }
 0x157   : > { %1066 = vst.msk [vmem:[#allocation2 + $0x4e] sm:$0x3] %vm1053_vm0, %v1006_v40  ;;  %447 = vrot.lane.b32.xlu1 %v1745_v3, %s1607_s12 }
 0x158   : > { %445 = vrot.lane.b32.xlu0 %v1735_v1, %s1607_s12 }
 0x159   : > { %v468_v41 = vpop.permute.xlu1 %467 }
 0x15a   : > { %v466_v11 = vpop.permute.xlu0 %465  ;;  %531 = vst.msk [vmem:[#allocation2 + $0x3e] sm:$0x3] %vm2459_vm5, %v468_v41 }
 0x15b   : > { %530 = vst.msk [vmem:[#allocation2 + $0x36] sm:$0xff] %vm519_vm6, %v466_v11  ;;  %546 = vrot.lane.b32.xlu1 %v1738_v2, %s1608_s14 }
 0x15c   : > { %449 = vrot.lane.b32.xlu0 %v1732_v0, %s1607_s12 }
 0x15d   : > { %v561_v8 = vpop.permute.xlu1 %560 }
 0x15e   : > { %v559_v17 = vpop.permute.xlu0 %558  ;;  %v1085_v42 = vld [vmem:[#allocation2 + $0x48] sm:$0xff]  ;;  %602 = vst.msk [vmem:[#allocation2 + $0x38] sm:$0xff] %vm594_vm7, %v561_v8 }
 0x15f   : > { %601 = vst.msk [vmem:[#allocation2 + $0x30] sm:$0xff] %vm594_vm7, %v559_v17  ;;  %1404 = vmatpush3.xpose.msk.msra.mxu0 %vm1099_vm2, %v1085_v42  ;;  %612 = vrot.lane.b32.xlu1 %v1738_v2, %s1609_s23 }
 0x160   : > { %548 = vrot.lane.b32.xlu0 %v1752_v4, %s1608_s14  ;;  %1405 = vmatprep.subr.mxu0 %v1613_v27  ;;  %s1234_s14 = sadd.s32 %s1588_s18, %s1368_s13  ;;  %s1617_s18 = smov [#allocation3]  }
 0x161   : > { %v633_v1 = vpop.permute.xlu1 %632  ;;  %s1516_s19 = sshll.u32 %s1617_s18, 4  ;;  %s1517_s19 = int_to_ptr.vmem [resolvable:$false] %s1516_s19 }
 0x162   : > { %v631_v3 = vpop.permute.xlu0 %630  ;;  %697 = vst.msk [vmem:[#allocation2 + $0x37] sm:$0xff] %vm2484_vm8, %v633_v1  ;;  %vm2489_vm8 = vcmask 228544   ;;  %s1518_s12 = scalar_lea.vmem %s1517_s19, 256 }
 0x163   : > { %696 = vst.msk [vmem:[#allocation2 + $0x2f] sm:$0xfe] %vm2485_vm9, %v631_v3  ;;  %616 = vrot.lane.b32.xlu1 %v1796_v12, %s1609_s23  ;;  %vm2490_vm9 = vcmask 261345  }
 0x164   : > { %614 = vrot.lane.b32.xlu0 %v1752_v4, %s1609_s23  ;;  %s1369_s23 = sshll.u32 %s1234_s14, 7 }
 0x165   : > { %v1002_v0 = vpop.permute.xlu1 %1001  ;;  %s2399_s27 = scalar_lea.hbm %s2449_s4, %s1369_s23 }
 0x166   : > { %v635_v43 = vpop.permute.xlu0 %634  ;;  %1064 = vst.msk [vmem:[#allocation2 + $0x3e] sm:$0xfc] %vm2486_vm1, %v1002_v0  ;;  %vm2491_vm1 = vmmov %vm2489_vm8 }
 0x167   : > { %698 = vst.msk [vmem:[#allocation2 + $0x3f] sm:$0x1] %vm2458_vm11, %v635_v43  ;;  %711 = vrot.lane.b32.xlu1 %v1738_v2, %s1610_s24 }
 0x168   : > { %983 = vrot.lane.b32.xlu0 %v1763_v7, %s1614_s8 }
 0x169   : > { %v732_v44 = vpop.permute.xlu1 %731 }
 0x16a   : > { %v730_v45 = vpop.permute.xlu0 %729  ;;  %796 = vst.msk [vmem:[#allocation2 + $0x36] sm:$0xff] %vm2487_vm3, %v732_v44  ;;  %vm1615_vm3 = vmmov 0  }
 0x16b   : > { %795 = vst.msk [vmem:[#allocation2 + $0x2e] sm:$0xfc] %vm2488_vm10, %v730_v45  ;;  %715 = vrot.lane.b32.xlu1 %v1796_v12, %s1610_s24  ;;  %1423 = vmatprep.mubr.msk.f32.mxu0 %vm1615_vm3, %v1613_v27  ;;  %vm2492_vm10 = vcmask 162945   ;;  %vm2496_vm3 = vcmask 195744  }
 0x16c   : > { %713 = vrot.lane.b32.xlu0 %v1752_v4, %s1610_s24  ;;  %s250_s24 = scalar_lea.vmem [#allocation3], %s1345_s11 }
 0x16d   : > { %v825_v46 = vpop.permute.xlu1 %824  ;;  %v1084_v48 = vld [vmem:[#allocation2 + $0x40] sm:$0xff] }
 0x16e   : > { %v734_v47 = vpop.permute.xlu0 %733  ;;  %867 = vst.msk [vmem:[#allocation2 + $0x30] sm:$0xff] %vm2489_vm8, %v825_v46  ;;  %1406 = vmatpush3.xpose.msk.msra.mxu0 %vm1099_vm2, %v1084_v48  ;;  %vm2493_vm8 = vcmask 162944  }
 0x16f   : > { %797 = vst.msk [vmem:[#allocation2 + $0x3e] sm:$0x3] %vm787_vm12, %v734_v47  ;;  %814 = vrot.lane.b32.xlu1 %v1755_v5, %s1611_s5  ;;  %1407 = vmatprep.subr.mxu0 %v1613_v27 }
 0x170   : > { %812 = vrot.lane.b32.xlu0 %v1758_v6, %s1611_s5  ;;  %s1238_s5 = sshll.u32 %s250_s24, 4  ;;  %s1239_s5 = int_to_ptr.vmem [resolvable:$true] %s1238_s5 }
 0x171   : > { %v897_v2 = vpop.permute.xlu1 %896  ;;  %s1512_s10 = scalar_lea.vmem %s1239_s5, 128  ;;  %p1519_p5 = scmp.lt.s32.totalorder %s1239_s5, %s1517_s19 }
 0x172   : > { %v827_v7 = vpop.permute.xlu0 %826  ;;  %962 = vst.msk [vmem:[#allocation2 + $0x2f] sm:$0xfe] %vm2490_vm9, %v897_v2  ;;  %vm2494_vm9 = vcmask 195746   ;;  %p1513_p1 = scmp.ne.s32.totalorder %s1239_s5, %s1512_s10  ;;  %p1520_p6 = scmp.lt.s32.totalorder %s1518_s12, %s1512_s10 }
 0x173   : > { %868 = vst.msk [vmem:[#allocation2 + $0x38] sm:$0xff] %vm2491_vm1, %v827_v7  ;;  %880 = vrot.lane.b32.xlu1 %v1755_v5, %s1612_s6  ;;  %vm2495_vm1 = vcmask 294146  }
 0x174   : > { %878 = vrot.lane.b32.xlu0 %v1758_v6, %s1612_s6  ;;  %p1514_p2 = pnand %p1513_p1, %p1694_p3  ;;  %p1521_p7 = por %p1520_p6, %p1519_p5 }
 0x175   : > { %v901_v4 = vpop.permute.xlu1 %900 }
 0x176   : > { %v899_v12 = vpop.permute.xlu0 %898  ;;  %964 = vst.msk [vmem:[#allocation2 + $0x3f] sm:$0x1] %vm954_vm13, %v901_v4  ;;  %p1515_p4 = pneg %p1514_p2 }
 0x177   : > { %963 = vst.msk [vmem:[#allocation2 + $0x37] sm:$0xff] %vm952_vm15, %v899_v12  ;;  %979 = vrot.lane.b32.xlu1 %v1755_v5, %s1614_s8 }
 0x178   : > { %882 = vrot.lane.b32.xlu0 %v1825_v16, %s1612_s6  ;;  %p1522_p9 = pnand %p1521_p7, %p1515_p4 }
 0x179   : > { %v1000_v49 = vpop.permute.xlu1 %999 }
 0x17a   : > { %v998_v51 = vpop.permute.xlu0 %997  ;;  %1063 = vst.msk [vmem:[#allocation2 + $0x3e] sm:$0x3] %vm1053_vm0, %v1000_v49 }
 0x17b   : > { %1062 = vst.msk [vmem:[#allocation2 + $0x36] sm:$0xff] %vm1051_vm14, %v998_v51  ;;  %977 = vrot.lane.b32.xlu1 %v1758_v6, %s1614_s8 }
 0x17c   : > { %981 = vrot.lane.b32.xlu0 %v1825_v16, %s1614_s8 }
 0x17d   : > { %v460_v52 = vpop.permute.xlu1 %459 }
 0x17e   : > { %v458_v5 = vpop.permute.xlu0 %457  ;;  %527 = vst.msk [vmem:[#allocation2 + $0x26] sm:$0xff] %vm519_vm6, %v460_v52 }
 0x17f   : > { %526 = vst.msk [vmem:[#allocation2 + $0x1e] sm:$0xfc] %vm517_vm4, %v458_v5 }
 0x180   : > { %1096 = vperm.xlu0 %1511, %v1093_v15  }
 0x181   : > { %v555_v6 = vpop.permute.xlu1 %554 }
 0x182   : > { %v462_v53 = vpop.permute.xlu0 %461  ;;  %v1083_v54 = vld [vmem:[#allocation2 + $0x38] sm:$0xff]  ;;  %599 = vst.msk [vmem:[#allocation2 + $0x20] sm:$0xff] %vm594_vm7, %v555_v6 }
 0x183   : > { %528 = vst.msk [vmem:[#allocation2 + $0x2e] sm:$0x3] %vm2459_vm5, %v462_v53  ;;  %1408 = vmatpush3.xpose.msk.msra.mxu0 %vm1099_vm2, %v1083_v54  ;;  %v1092_v53 = vld [vmem:[%s2447_s2] sm:$0xff] }
 0x184   : > { %1409 = vmatprep.subr.mxu0 %v1613_v27 }
 0x185   : > { %v625_v16 = vpop.permute.xlu1 %624 }
 0x186   : > { %v557_v55 = vpop.permute.xlu0 %556  ;;  %693 = vst.msk [vmem:[#allocation2 + $0x1f] sm:$0xfe] %vm2492_vm10, %v625_v16  ;;  %vm2497_vm10 = vcmask 228544  }
 0x187   : > { %600 = vst.msk [vmem:[#allocation2 + $0x28] sm:$0xff] %vm594_vm7, %v557_v55 }
 0x189   : > { %v629_v56 = vpop.permute.xlu1 %628 }
 0x18a   : > { %v627_v57 = vpop.permute.xlu0 %626  ;;  %695 = vst.msk [vmem:[#allocation2 + $0x2f] sm:$0x1] %vm2458_vm11, %v629_v56  ;;  %vm2498_vm11 = vmmov %vm2497_vm10 }
 0x18b   : > { %694 = vst.msk [vmem:[#allocation2 + $0x27] sm:$0xff] %vm2493_vm8, %v627_v57  ;;  %vm2499_vm8 = vcmask 261345  }
 0x18d   : > { %v724_v58 = vpop.permute.xlu1 %723 }
 0x18e   : > { %v996_v59 = vpop.permute.xlu0 %995  ;;  %792 = vst.msk [vmem:[#allocation2 + $0x1e] sm:$0xfc] %vm2494_vm9, %v724_v58  ;;  %vm2501_vm9 = vcmask 162945  }
 0x18f   : > { %1061 = vst.msk [vmem:[#allocation2 + $0x2e] sm:$0xfc] %vm2495_vm1, %v996_v59 }
 0x191   : > { %v728_v60 = vpop.permute.xlu1 %727 }
 0x192   : > { %v726_v61 = vpop.permute.xlu0 %725  ;;  %794 = vst.msk [vmem:[#allocation2 + $0x2e] sm:$0x3] %vm787_vm12, %v728_v60 }
 0x193   : > { %793 = vst.msk [vmem:[#allocation2 + $0x26] sm:$0xff] %vm2496_vm3, %v726_v61  ;;  %vm2502_vm3 = vcmask 155776  }
 0x195   : > { %v823_v14 = vpop.permute.xlu1 %822 }
 0x196   : > { %v821_v62 = vpop.permute.xlu0 %820  ;;  %v1082_v63 = vld [vmem:[#allocation2 + $0x30] sm:$0xff]  ;;  %866 = vst.msk [vmem:[#allocation2 + $0x28] sm:$0xff] %vm2497_vm10, %v823_v14  ;;  %vm2503_vm10 = vcmask 195744  }
 0x197   : > { %865 = vst.msk [vmem:[#allocation2 + $0x20] sm:$0xff] %vm2498_vm11, %v821_v62  ;;  %1410 = vmatpush3.xpose.msk.msra.mxu0 %vm1099_vm2, %v1082_v63  ;;  %vm2500_vm11 = vcmask 162944  }
 0x198   : > { %1411 = vmatprep.subr.mxu0 %v1613_v27 }
 0x199   : > { %v893_v9 = vpop.permute.xlu1 %892 }
 0x19a   : > { %v891_v19 = vpop.permute.xlu0 %890  ;;  %960 = vst.msk [vmem:[#allocation2 + $0x27] sm:$0xff] %vm952_vm15, %v893_v9 }
 0x19b   : > { %959 = vst.msk [vmem:[#allocation2 + $0x1f] sm:$0xfe] %vm2499_vm8, %v891_v19  ;;  %vm2504_vm8 = vcmask 195746  }
 0x19d   : > { %v992_v21 = vpop.permute.xlu1 %991 }
 0x19e   : > { %v895_v10 = vpop.permute.xlu0 %894  ;;  %1059 = vst.msk [vmem:[#allocation2 + $0x26] sm:$0xff] %vm1051_vm14, %v992_v21 }
 0x19f   : > { %961 = vst.msk [vmem:[#allocation2 + $0x2f] sm:$0x1] %vm954_vm13, %v895_v10 }
 0x1a1   : > { %v452_v22 = vpop.permute.xlu1 %451 }
 0x1a2   : > { %v994_v23 = vpop.permute.xlu0 %993  ;;  %523 = vst.msk [vmem:[#allocation2 + $0xe] sm:$0xfc] %vm517_vm4, %v452_v22 }
 0x1a3   : > { %1060 = vst.msk [vmem:[#allocation2 + $0x2e] sm:$0x3] %vm1053_vm0, %v994_v23 }
 0x1a5   : > { %v456_v20 = vpop.permute.xlu1 %455 }
 0x1a6   : > { %v454_v24 = vpop.permute.xlu0 %453  ;;  %525 = vst.msk [vmem:[#allocation2 + $0x1e] sm:$0x3] %vm2459_vm5, %v456_v20  ;;  %vm2505_vm5 = vcmask 228544  }
 0x1a7   : > { %524 = vst.msk [vmem:[#allocation2 + $0x16] sm:$0xff] %vm519_vm6, %v454_v24 }
 0x1a9   : > { %v553_v50 = vpop.permute.xlu1 %552 }
 0x1aa   : > { %v551_v25 = vpop.permute.xlu0 %550  ;;  %v1081_v26 = vld [vmem:[#allocation2 + $0x28] sm:$0xff]  ;;  %598 = vst.msk [vmem:[#allocation2 + $0x18] sm:$0xff] %vm594_vm7, %v553_v50 }
 0x1ab   : > { %597 = vst.msk [vmem:[#allocation2 + $0x10] sm:$0xff] %vm594_vm7, %v551_v25  ;;  %1412 = vmatpush3.xpose.msk.msra.mxu0 %vm1099_vm2, %v1081_v26 }
 0x1ac   : > { %1413 = vmatprep.subr.mxu0 %v1613_v27 }
 0x1ad   : > { %v621_v30 = vpop.permute.xlu1 %620 }
 0x1ae   : > { %v619_v31 = vpop.permute.xlu0 %618  ;;  %691 = vst.msk [vmem:[#allocation2 + $0x17] sm:$0xff] %vm2500_vm11, %v621_v30  ;;  %vm2506_vm11 = vcmask 261345  }
 0x1af   : > { %690 = vst.msk [vmem:[#allocation2 + $0xf] sm:$0xfe] %vm2501_vm9, %v619_v31  ;;  %vm2507_vm9 = vmmov %vm2505_vm5 }
 0x1b1   : > { %v990_v32 = vpop.permute.xlu1 %989 }
 0x1b2   : > { %v623_v13 = vpop.permute.xlu0 %622  ;;  %1058 = vst.msk [vmem:[#allocation2 + $0x1e] sm:$0xfc] %vm2495_vm1, %v990_v32  ;;  %vm2509_vm1 = vcmask 162945  }
 0x1b3   : > { %692 = vst.msk [vmem:[#allocation2 + $0x1f] sm:$0x1] %vm2502_vm3, %v623_v13 }
 0x1b5   : > { %v720_v33 = vpop.permute.xlu1 %719 }
 0x1b6   : > { %v718_v18 = vpop.permute.xlu0 %717  ;;  %790 = vst.msk [vmem:[#allocation2 + $0x16] sm:$0xff] %vm2503_vm10, %v720_v33  ;;  %vm2513_vm10 = vcmask 294146  }
 0x1b7   : > { %789 = vst.msk [vmem:[#allocation2 + $0xe] sm:$0xfc] %vm2504_vm8, %v718_v18 }
 0x1b9   : > { %v817_v28 = vpop.permute.xlu1 %816  ;;  %v1080_v35 = vld [vmem:[#allocation2 + $0x20] sm:$0xff] }
 0x1ba   : > { %v722_v34 = vpop.permute.xlu0 %721  ;;  %863 = vst.msk [vmem:[#allocation2 + $0x10] sm:$0xff] %vm2505_vm5, %v817_v28  ;;  %1414 = vmatpush3.xpose.msk.msra.mxu0 %vm1099_vm2, %v1080_v35  ;;  %vm2508_vm5 = vcmask 91200  }
 0x1bb   : > { %791 = vst.msk [vmem:[#allocation2 + $0x1e] sm:$0x3] %vm787_vm12, %v722_v34  ;;  %1415 = vmatprep.subr.mxu0 %v1613_v27 }
 0x1bd   : > { %v885_v36 = vpop.permute.xlu1 %884 }
 0x1be   : > { %v819_v37 = vpop.permute.xlu0 %818  ;;  %956 = vst.msk [vmem:[#allocation2 + $0xf] sm:$0xfe] %vm2506_vm11, %v885_v36 }
 0x1bf   : > { %864 = vst.msk [vmem:[#allocation2 + $0x18] sm:$0xff] %vm2507_vm9, %v819_v37 }
 0x1c1   : > { %v889_v38 = vpop.permute.xlu1 %888 }
 0x1c2   : > { %v887_v39 = vpop.permute.xlu0 %886  ;;  %958 = vst.msk [vmem:[#allocation2 + $0x1f] sm:$0x1] %vm954_vm13, %v889_v38 }
 0x1c3   : > { %957 = vst.msk [vmem:[#allocation2 + $0x17] sm:$0xff] %vm952_vm15, %v887_v39 }
 0x1c5   : > { %v988_v40 = vpop.permute.xlu1 %987 }
 0x1c6   : > { %v986_v41 = vpop.permute.xlu0 %985  ;;  %1057 = vst.msk [vmem:[#allocation2 + $0x1e] sm:$0x3] %vm1053_vm0, %v988_v40 }
 0x1c7   : > { %1056 = vst.msk [vmem:[#allocation2 + $0x16] sm:$0xff] %vm1051_vm14, %v986_v41 }
 0x1c9   : > { %v448_v11 = vpop.permute.xlu1 %447 }
 0x1ca   : > { %v446_v8 = vpop.permute.xlu0 %445  ;;  %520 = vst.msk [vmem:[#allocation2 + $0x6] sm:$0xff] %vm519_vm6, %v448_v11  ;;  %vm2511_vm6 = vcmask 162944  }
 0x1cb   : > { %518 = vst.msk [vmem:[#allocation2 - $0x2] sm:$0xfc] %vm517_vm4, %v446_v8  ;;  %vm2510_vm4 = vmmov %vm2502_vm3 }
 0x1cc   : > { %vm2512_vm3 = vmmov %vm2504_vm8  ;;  %vm2514_vm8 = vcmask 195744  }
 0x1cd   : > { %v547_v17 = vpop.permute.xlu1 %546 }
 0x1ce   : > { %v450_v42 = vpop.permute.xlu0 %449  ;;  %v1079_v1 = vld [vmem:[#allocation2 + $0x18] sm:$0xff]  ;;  %595 = vst.msk [vmem:[#allocation2] sm:$0xff] %vm594_vm7, %v547_v17 }
 0x1cf   : > { %522 = vst.msk [vmem:[#allocation2 + $0xe] sm:$0x3] %vm2508_vm5, %v450_v42  ;;  %1416 = vmatpush3.xpose.msk.msra.mxu0 %vm1099_vm2, %v1079_v1 }
 0x1d0   : > { %1417 = vmatprep.subr.mxu0 %v1613_v27 }
 0x1d1   : > { %v613_v3 = vpop.permute.xlu1 %612 }
 0x1d2   : > { %v549_v0 = vpop.permute.xlu0 %548  ;;  %685 = vst.msk [vmem:[#allocation2 - $0x1] sm:$0xfe] %vm2509_vm1, %v613_v3 }
 0x1d3   : > { %596 = vst.msk [vmem:[#allocation2 + $0x8] sm:$0xff] %vm594_vm7, %v549_v0  ;;  %vm2515_vm7 = vmmov %vm2507_vm9  ;;  %vm2517_vm9 = vcmask 261345  }
 0x1d4   : > { %vm2516_vm11 = vmmov %vm2515_vm7 }
 0x1d5   : > { %v617_v43 = vpop.permute.xlu1 %616 }
 0x1d6   : > { %v615_v44 = vpop.permute.xlu0 %614  ;;  %689 = vst.msk [vmem:[#allocation2 + $0xf] sm:$0x1] %vm2510_vm4, %v617_v43 }
 0x1d7   : > { %687 = vst.msk [vmem:[#allocation2 + $0x7] sm:$0xff] %vm2511_vm6, %v615_v44 }
 0x1d9   : > { %v712_v45 = vpop.permute.xlu1 %711 }
 0x1da   : > { %v984_v46 = vpop.permute.xlu0 %983  ;;  %784 = vst.msk [vmem:[#allocation2 - $0x2] sm:$0xfc] %vm2512_vm3, %v712_v45 }
 0x1db   : > { %1055 = vst.msk [vmem:[#allocation2 + $0xe] sm:$0xfc] %vm2513_vm10, %v984_v46 }
 0x1dd   : > { %v716_v47 = vpop.permute.xlu1 %715 }
 0x1de   : > { %v714_v48 = vpop.permute.xlu0 %713  ;;  %788 = vst.msk [vmem:[#allocation2 + $0xe] sm:$0x3] %vm787_vm12, %v716_v47  ;;  %vm2518_vm12 = vmmov %vm2513_vm10 }
 0x1df   : > { %786 = vst.msk [vmem:[#allocation2 + $0x6] sm:$0xff] %vm2514_vm8, %v714_v48 }
 0x1e1   : > { %v815_v2 = vpop.permute.xlu1 %814 }
 0x1e2   : > { %v813_v7 = vpop.permute.xlu0 %812  ;;  %v1078_v4 = vld [vmem:[#allocation2 + $0x10] sm:$0xff]  ;;  %862 = vst.msk [vmem:[#allocation2 + $0x8] sm:$0xff] %vm2515_vm7, %v815_v2 }
 0x1e3   : > { %861 = vst.msk [vmem:[#allocation2] sm:$0xff] %vm2516_vm11, %v813_v7  ;;  %1418 = vmatpush3.xpose.msk.msra.mxu0 %vm1099_vm2, %v1078_v4 }
 0x1e4   : > { %1419 = vmatprep.subr.mxu0 %v1613_v27 }
 0x1e5   : > { %v881_v12 = vpop.permute.xlu1 %880 }
 0x1e6   : > { %v879_v49 = vpop.permute.xlu0 %878  ;;  %953 = vst.msk [vmem:[#allocation2 + $0x7] sm:$0xff] %vm952_vm15, %v881_v12 }
 0x1e7   : > { %951 = vst.msk [vmem:[#allocation2 - $0x1] sm:$0xfe] %vm2517_vm9, %v879_v49 }
 0x1e9   : > { %v980_v51 = vpop.permute.xlu1 %979 }
 0x1ea   : > { %v883_v52 = vpop.permute.xlu0 %882  ;;  %1052 = vst.msk [vmem:[#allocation2 + $0x6] sm:$0xff] %vm1051_vm14, %v980_v51 }
 0x1eb   : > { %955 = vst.msk [vmem:[#allocation2 + $0xf] sm:$0x1] %vm954_vm13, %v883_v52 }
 0x1ed   : > { %v978_v5 = vpop.permute.xlu1 %977 }
 0x1ee   : > { %v982_v15 = vpop.permute.xlu0 %981  ;;  %1050 = vst.msk [vmem:[#allocation2 - $0x2] sm:$0xfc] %vm2518_vm12, %v978_v5 }
 0x1ef   : > { %1054 = vst.msk [vmem:[#allocation2 + $0xe] sm:$0x3] %vm1053_vm0, %v982_v15 }
 0x1f5   : > { %v1076_v6 = vld [vmem:[#allocation2] sm:$0xff] }
 0x1f6   : > { %v1077_v29 = vld [vmem:[#allocation2 + $0x8] sm:$0xff] }
 0x1f7   : > { %1420 = vmatpush3.xpose.msk.msra.mxu0 %vm1099_vm2, %v1077_v29 }
 0x1f8   : > { %1421 = vmatprep.subr.mxu0 %v1613_v27 }
 0x1fb   : > { %1422 = vmatpush3.xpose.msk.msra.mxu0 %vm1099_vm2, %v1076_v6  ;;  %v1097_v54 = vpop.permute.xlu0 %1096 }
 0x1fe   : > { %1424 = vmatmul.mubr.msk.f32.vlgmr.msra.gmra.mxu0 %vm1099_vm2, %v1092_v53 }
 0x2be   : > { %v1217_v16 = vpop.f32.mrf.mxu0 }
 0x2bf   : > { %v1218_v27 = vadd.f32 %v1217_v16, %v1097_v54 }
 0x2c0   : > { %v1425_v55 = vpop.f32.mrf.mxu0 }
 0x2c1   : > { %1221 = vst [vmem:[%s250_s24] sm:$0xff] %v1218_v27 }
 0x2c2   : > { %1525 = shalt.err (!%p1522_p9)
}
 0x2c3   : > { %s1526_s11 = scalar_lea.hbm %s2399_s27, 128  ;;  %s1530_s14 = scalar_lea.hbm %s2449_s4, 512 }
 0x2c4   : > { %p1527_p10 = scmp.ne.s32.totalorder %s2399_s27, %s1526_s11  ;;  %p1531_p13 = scmp.lt.s32.totalorder %s2399_s27, %s2449_s4 }
 0x2c5   : > { %p1532_p0 = scmp.lt.s32.totalorder %s1530_s14, %s1526_s11 }
 0x2c6   : > { %p1528_p11 = pnand %p1527_p10, %p1694_p3 }
 0x2c7   : > { %p1533_p1 = por %p1532_p0, %p1531_p13 }
 0x2c8   : > { %p1529_p12 = pneg %p1528_p11 }
 0x2ca   : > { %p1534_p2 = pnand %p1533_p1, %p1529_p12 }
 0x2cc   : > { %1537 = shalt.err (!%p1534_p2)
}
 0x2cd   : > { %1429 = dma.vmem_to_hbm [thread:$0]  (%p1694_p3), %s1239_s5, 128, %s2399_s27, %s1223_s30  }
 0x2ce PF: > { %p1435_p4 = scmp.ge.s32.totalorder %s1604_s22, 2  ;;  %s1250_s6 = sand.u32 1, %s1576_s15  }
 0x2cf   : > { %s1251_s8 = scalar_lea.sflag [#allocation4], %s1250_s6 }
 0x2d0   : > { %p1432_p5 = pnand %p1435_p4, %p1703_p8 }
 0x2d2   : > { %p1433_p6 = pneg %p1432_p5 }
 0x2d4   : > { %1571 = dma.done.wait (%p1433_p6), %s1251_s8, 128  }
 0x2d5   : > { %1573 = vsyncadd (%p1433_p6), %s1251_s8, 4294967168  ;;  %s17_s22 = sadd.s32 1, %s1604_s22   ;;  %s2519_s15 = smov %s1580_s16 }
 0x2d6   : > { %p14_p7 = scmp.ge.s32.totalorder %s17_s22, 6   ;;  %s2520_s16 = smov %s1584_s17 }
 0x2d7   : > { %s2521_s17 = smov %s1712_s7  ;;  %s2522_s18 = smov %s1596_s20 }
 0x2d8   : > { %s2523_s19 = smov %s1600_s21  ;;  %s2524_s20 = smov %s2527_s25 }
 0x2d9   : > { %s2525_s21 = smov %s2531_s26  ;;  %16 = sbr.rel (!%p14_p7) target bundleno = 5 (0x5), region = 74 }
 0x2de   :  { %1256 = vsyncpa [#allocation4], 1 }
 0x2df   :  { %1258 = vsyncpa [#allocation4 + $0x1], 1 }

</bundles_post_ra>
